<compile_context>
chip_gen: v6e
topology: v6e:2x2x1
jax: 0.10.0
libtpu: 0.0.40
codegen_flags: <defaults>
</compile_context>

<pallas_src>
import functools

import jax
import jax.numpy as jnp
from jax import lax
from jax.experimental import pallas as pl
from jax.experimental.pallas import tpu as pltpu


def _nll_kernel(x_ref, t_ref, out_ref, acc_ref, *,
                beta, n_valid, tile, steps, class_axis):
    """One (classes x samples) or (samples x classes) tile of the NLL sum.

    class_axis == 0: x_ref is (C, tile)   (samples dense on lanes, small C)
    class_axis == 1: x_ref is (tile, C)   (natural layout, C >= 128)
    """
    i = pl.program_id(0)          # parallel chunk (megacore axis on v7x)
    j = pl.program_id(1)          # sequential step within the chunk

    @pl.when(j == 0)
    def _():
        acc_ref[...] = jnp.zeros_like(acc_ref)

    x = x_ref[...].astype(jnp.float32)
    t = t_ref[...]                                   # int32, broadcastable to x
    sample_axis = 1 - class_axis

    # --- gather(inputs, class_axis, targets) via one-hot mask ----------------
    cls = lax.broadcasted_iota(jnp.int32, x.shape, class_axis)
    energy_c = jnp.sum(jnp.where(cls == t, x, 0.0),
                       axis=class_axis, keepdims=True)

    # --- free_energy = -logsumexp(-beta * x) / beta  (beta > 0) --------------
    # max(-beta*x) = -beta*min(x)  =>  free_energy = min(x) - log(sum p)/beta
    m = jnp.min(x, axis=class_axis, keepdims=True)
    p = jnp.exp((m - x) * beta)
    free_energy = m - jnp.log(jnp.sum(p, axis=class_axis, keepdims=True)) / beta

    nll = energy_c - free_energy                     # (1, tile) or (tile, 1)

    # --- mask out zero-padded samples beyond the true N ----------------------
    base = (i * steps + j) * tile
    samp = base + lax.broadcasted_iota(jnp.int32, nll.shape, sample_axis)
    nll = jnp.where(samp < n_valid, nll, 0.0)

    # Elementwise partial-sum accumulation (no per-step tree reduce).
    acc_ref[...] += nll

    @pl.when(j == pl.num_programs(1) - 1)
    def _():
        out_ref[0] = acc_ref[...]


def _round_up(x, m):
    return ((x + m - 1) // m) * m


def nll_loss_pallas(inputs, targets, beta, *, tile=None, num_parallel=2):
    """Energy-based NLL loss. inputs: (N, C) float, targets: (N,) int."""
    assert beta > 0, "beta for energy calculate must be larger than 0"
    n, c = inputs.shape
    targets = targets.astype(jnp.int32)

    # Lane-dense layout choice: classes on sublanes when C is small.
    transposed = c < 128
    gran = 128 if transposed else 8           # sample-tile granularity
    per_chunk = -(-n // num_parallel)         # cdiv(n, num_parallel)

    if tile is None:
        # ~4 MiB per (double-buffered) input block keeps per-step overhead
        # amortized while fitting comfortably in VMEM on v5e/v6e/v7x.
        budget_bytes = 4 * 1024 * 1024
        tile = max(gran, (budget_bytes // (c * 4)) // gran * gran)
    tile = max(gran, min(tile, _round_up(per_chunk, gran)))
    steps = -(-per_chunk // tile)
    n_pad = num_parallel * steps * tile

    x = inputs
    t = targets
    if n_pad != n:
        x = jnp.pad(x, ((0, n_pad - n), (0, 0)))
        t = jnp.pad(t, (0, n_pad - n))

    if transposed:
        # One extra HBM pass for the transpose, paid only when C < 128; the
        # kernel then runs fully lane-dense (samples across the 128 lanes).
        x_in = jnp.transpose(x)                       # (C, n_pad)
        t_in = t.reshape(1, n_pad)
        x_spec = pl.BlockSpec((c, tile), lambda i, j: (0, i * steps + j))
        t_spec = pl.BlockSpec((1, tile), lambda i, j: (0, i * steps + j))
        acc_shape = (1, tile)
        class_axis = 0
    else:
        x_in = x                                      # (n_pad, C), already lane-dense
        t_in = t.reshape(n_pad, 1)
        x_spec = pl.BlockSpec((tile, c), lambda i, j: (i * steps + j, 0))
        t_spec = pl.BlockSpec((tile, 1), lambda i, j: (i * steps + j, 0))
        acc_shape = (tile, 1)
        class_axis = 1

    kernel = functools.partial(
        _nll_kernel, beta=float(beta), n_valid=n, tile=tile, steps=steps,
        class_axis=class_axis)

    partials = pl.pallas_call(
        kernel,
        out_shape=jax.ShapeDtypeStruct((num_parallel,) + acc_shape, jnp.float32),
        grid_spec=pltpu.PrefetchScalarGridSpec(
            num_scalar_prefetch=0,
            grid=(num_parallel, steps),
            in_specs=[x_spec, t_spec],
            out_specs=pl.BlockSpec((1,) + acc_shape, lambda i, j: (i, 0, 0)),
            scratch_shapes=[pltpu.VMEM(acc_shape, jnp.float32)],
        ),
        compiler_params=pltpu.CompilerParams(
            dimension_semantics=("parallel", "arbitrary"),
            # > v5e's 16 MiB default scoped VMEM, < v7x's 64 MiB physical.
            vmem_limit_bytes=48 * 1024 * 1024,
        ),
    )(x_in, t_in)

    # Final mean over all per-sample partials (tiny), done in plain JAX.
    return jnp.sum(partials) / jnp.float32(n)


def nll_loss_ref(inputs, targets, beta):
    """Pure-JAX reference mirroring the PyTorch forward."""
    x = inputs.astype(jnp.float32)
    energy_c = jnp.take_along_axis(x, targets.astype(jnp.int32)[:, None], axis=1)
    free_energy = -jax.nn.logsumexp(-beta * x, axis=1, keepdims=True) / beta
    return jnp.mean(energy_c - free_energy)


if __name__ == "__main__":
    BETA = 0.5
    key = jax.random.PRNGKey(0)
    k1, k2, k3, k4 = jax.random.split(key, 4)

    # Case 1: small class count -> lane-dense (C, N) path; N not a multiple of
    # the tile -> exercises the in-kernel padding mask.
    n1, c1 = 4000, 32
    x1 = jax.random.normal(k1, (n1, c1), dtype=jnp.float32)
    t1 = jax.random.randint(k2, (n1,), 0, c1, dtype=jnp.int32)
    out1 = jax.block_until_ready(nll_loss_pallas(x1, t1, BETA))
    ref1 = nll_loss_ref(x1, t1, BETA)
    assert jnp.allclose(out1, ref1, atol=1e-4, rtol=1e-5), (out1, ref1)

    # Case 2: C >= 128 -> natural (N, C) layout path (no transpose).
    n2, c2 = 1000, 160
    x2 = jax.random.normal(k3, (n2, c2), dtype=jnp.float32)
    t2 = jax.random.randint(k4, (n2,), 0, c2, dtype=jnp.int32)
    out2 = jax.block_until_ready(nll_loss_pallas(x2, t2, BETA))
    ref2 = nll_loss_ref(x2, t2, BETA)
    assert jnp.allclose(out2, ref2, atol=1e-4, rtol=1e-5), (out2, ref2)

    print("KERNEL_OK")
</pallas_src>

<mosaic_0001>
module attributes {stable_mosaic.version = 11 : i64} {
  func.func @_nll_kernel(%arg0: i32, %arg1: i32, %arg2: memref<32x2048xf32, #tpu.memory_space<vmem>>, %arg3: memref<1x2048xi32, #tpu.memory_space<vmem>>, %arg4: memref<1x1x2048xf32, #tpu.memory_space<vmem>>, %arg5: memref<1x2048xf32, #tpu.memory_space<vmem>>) attributes {dimension_semantics = [#tpu.dimension_semantics<parallel>, #tpu.dimension_semantics<arbitrary>], iteration_bounds = array<i64: 2, 1>, scalar_prefetch = 0 : i64, scratch_operands = 1 : i64, tpu.core_type = #tpu.core_type<tc>, window_params = [{transform_indices = @transform_0, window_bounds = array<i64: 32, 2048>}, {transform_indices = @transform_1, window_bounds = array<i64: 1, 2048>}, {transform_indices = @transform_2, window_bounds = array<i64: 1, 1, 2048>}]} {
    %c0_i32 = arith.constant 0 : i32
    %0 = arith.cmpi eq, %arg1, %c0_i32 : i32
    %1 = arith.extui %0 : i1 to i32
    %c0_i32_0 = arith.constant 0 : i32
    %2 = arith.cmpi ne, %1, %c0_i32_0 : i32
    scf.if %2 {
      %cst_16 = arith.constant 0.000000e+00 : f32
      %42 = vector.broadcast %cst_16 : f32 to vector<1x2048xf32>
      %c0_17 = arith.constant 0 : index
      %c0_18 = arith.constant 0 : index
      %43 = vector.load %arg5[%c0_17, %c0_18] : memref<1x2048xf32, #tpu.memory_space<vmem>>, vector<1x2048xf32>
      tpu.vector_store %arg5[%c0_17, %c0_18], %42 {strides = array<i32>} : memref<1x2048xf32, #tpu.memory_space<vmem>>, vector<1x2048xf32>,
    } else {
    }
    %c0 = arith.constant 0 : index
    %c0_1 = arith.constant 0 : index
    %3 = vector.load %arg2[%c0, %c0_1] : memref<32x2048xf32, #tpu.memory_space<vmem>>, vector<32x2048xf32>
    %c0_2 = arith.constant 0 : index
    %c0_3 = arith.constant 0 : index
    %4 = vector.load %arg3[%c0_2, %c0_3] : memref<1x2048xi32, #tpu.memory_space<vmem>>, vector<1x2048xi32>
    %5 = tpu.iota {dimensions = array<i32: 0>} : vector<32x2048xi32>
    %6 = vector.broadcast %4 : vector<1x2048xi32> to vector<32x2048xi32>
    %7 = arith.cmpi eq, %5, %6 : vector<32x2048xi32>
    %cst = arith.constant 0.000000e+00 : f32
    %8 = vector.broadcast %cst : f32 to vector<32x2048xf32>
    %9 = arith.select %7, %3, %8 : vector<32x2048xi1>, vector<32x2048xf32>
    %cst_4 = arith.constant dense<0.000000e+00> : vector<2048xf32>
    %10 = vector.multi_reduction <add>, %9, %cst_4 [0] : vector<32x2048xf32> to vector<2048xf32>
    %11 = vector.shape_cast %10 : vector<2048xf32> to vector<1x2048xf32>
    %cst_5 = arith.constant dense<0x7F800000> : vector<2048xf32>
    %12 = vector.multi_reduction <minimumf>, %3, %cst_5 [0] : vector<32x2048xf32> to vector<2048xf32>
    %13 = vector.shape_cast %12 : vector<2048xf32> to vector<1x2048xf32>
    %14 = vector.broadcast %13 : vector<1x2048xf32> to vector<32x2048xf32>
    %15 = arith.subf %14, %3 : vector<32x2048xf32>
    %cst_6 = arith.constant 5.000000e-01 : f32
    %16 = vector.broadcast %cst_6 : f32 to vector<32x2048xf32>
    %17 = arith.mulf %15, %16 : vector<32x2048xf32>
    %18 = math.exp %17 : vector<32x2048xf32>
    %cst_7 = arith.constant dense<0.000000e+00> : vector<2048xf32>
    %19 = vector.multi_reduction <add>, %18, %cst_7 [0] : vector<32x2048xf32> to vector<2048xf32>
    %20 = vector.shape_cast %19 : vector<2048xf32> to vector<1x2048xf32>
    %21 = math.log %20 : vector<1x2048xf32>
    %cst_8 = arith.constant 5.000000e-01 : f32
    %22 = vector.broadcast %cst_8 : f32 to vector<1x2048xf32>
    %23 = arith.divf %21, %22 : vector<1x2048xf32>
    %24 = arith.subf %13, %23 : vector<1x2048xf32>
    %25 = arith.subf %11, %24 : vector<1x2048xf32>
    %c1_i32 = arith.constant 1 : i32
    %26 = arith.muli %arg0, %c1_i32 : i32
    %27 = arith.addi %26, %arg1 : i32
    %c2048_i32 = arith.constant 2048 : i32
    %28 = arith.muli %27, %c2048_i32 : i32
    %29 = tpu.iota {dimensions = array<i32: 1>} : vector<1x2048xi32>
    %30 = vector.broadcast %28 : i32 to vector<1x2048xi32>
    %31 = arith.addi %30, %29 : vector<1x2048xi32>
    %c4000_i32 = arith.constant 4000 : i32
    %32 = vector.broadcast %c4000_i32 : i32 to vector<1x2048xi32>
    %33 = arith.cmpi slt, %31, %32 : vector<1x2048xi32>
    %cst_9 = arith.constant 0.000000e+00 : f32
    %34 = vector.broadcast %cst_9 : f32 to vector<1x2048xf32>
    %35 = arith.select %33, %25, %34 : vector<1x2048xi1>, vector<1x2048xf32>
    %c0_10 = arith.constant 0 : index
    %c0_11 = arith.constant 0 : index
    %36 = vector.load %arg5[%c0_10, %c0_11] : memref<1x2048xf32, #tpu.memory_space<vmem>>, vector<1x2048xf32>
    %37 = arith.addf %36, %35 : vector<1x2048xf32>
    %c0_12 = arith.constant 0 : index
    %c0_13 = arith.constant 0 : index
    %38 = vector.load %arg5[%c0_12, %c0_13] : memref<1x2048xf32, #tpu.memory_space<vmem>>, vector<1x2048xf32>
    tpu.vector_store %arg5[%c0_12, %c0_13], %37 {strides = array<i32>} : memref<1x2048xf32, #tpu.memory_space<vmem>>, vector<1x2048xf32>,
    %c0_i32_14 = arith.constant 0 : i32
    %39 = arith.cmpi eq, %arg1, %c0_i32_14 : i32
    %40 = arith.extui %39 : i1 to i32
    %c0_i32_15 = arith.constant 0 : i32
    %41 = arith.cmpi ne, %40, %c0_i32_15 : i32
    scf.if %41 {
      %c0_16 = arith.constant 0 : index
      %c0_17 = arith.constant 0 : index
      %42 = vector.load %arg5[%c0_16, %c0_17] : memref<1x2048xf32, #tpu.memory_space<vmem>>, vector<1x2048xf32>
      %c0_18 = arith.constant 0 : index
      %c0_19 = arith.constant 0 : index
      %c0_20 = arith.constant 0 : index
      %43 = vector.load %arg4[%c0_18, %c0_19, %c0_20] : memref<1x1x2048xf32, #tpu.memory_space<vmem>>, vector<1x1x2048xf32>
      %44 = vector.shape_cast %43 : vector<1x1x2048xf32> to vector<1x2048xf32>
      %45 = vector.shape_cast %42 : vector<1x2048xf32> to vector<1x1x2048xf32>
      tpu.vector_store %arg4[%c0_18, %c0_19, %c0_20], %45 {strides = array<i32>} : memref<1x1x2048xf32, #tpu.memory_space<vmem>>, vector<1x1x2048xf32>,
    } else {
    }
    return
  }
  func.func @transform_0(%arg0: i32, %arg1: i32) -> (i32, i32) {
    %c1_i32 = arith.constant 1 : i32
    %0 = arith.muli %arg0, %c1_i32 : i32
    %1 = arith.addi %0, %arg1 : i32
    %c0_i32 = arith.constant 0 : i32
    %c0_i32_0 = arith.constant 0 : i32
    return %c0_i32, %1 : i32, i32
  }
  func.func @transform_1(%arg0: i32, %arg1: i32) -> (i32, i32) {
    %c1_i32 = arith.constant 1 : i32
    %0 = arith.muli %arg0, %c1_i32 : i32
    %1 = arith.addi %0, %arg1 : i32
    %c0_i32 = arith.constant 0 : i32
    %c0_i32_0 = arith.constant 0 : i32
    return %c0_i32, %1 : i32, i32
  }
  func.func @transform_2(%arg0: i32, %arg1: i32) -> (i32, i32, i32) {
    %c0_i32 = arith.constant 0 : i32
    %c0_i32_0 = arith.constant 0 : i32
    %c0_i32_1 = arith.constant 0 : i32
    return %arg0, %c0_i32, %c0_i32_0 : i32, i32, i32
  }
}

</mosaic_0001>

<bundles_post_ra>
// kernel: tpu_custom_call.1
= control target key start
LH: loop header
LB: loop body
LE: loop exit
PB: predicated region body
PF: predicated region fallthrough
CT: control target
= control target key end

     0   :  { %s3803_s0 = inlined_call_operand.hbm [shape: f32[32,4096], index: 0, kind: input, shape index: {}]   ;;  %s3804_s1 = inlined_call_operand.hbm [shape: s32[1,4096], index: 1, kind: input, shape index: {}]   ;;  %s3805_s2 = inlined_call_operand.hbm [shape: f32[2,1,2048], index: 2, kind: output, shape index: {}]  }
   0x1   :  { %3879 = sst [smem:[#allocation75_spill]] %s3803_s0 }
   0x2   :  { %7 = vsyncpa [#allocation4], 0 }
   0x3   :  { %9 = vsyncpa [#allocation4 + $0x1], 0 }
   0x4   :  { %10 = vsyncpa [#allocation7], 0 }
   0x5   :  { %12 = vsyncpa [#allocation7 + $0x1], 0 }
   0x6   :  { %13 = vsyncpa [#allocation5], 0 }
   0x7   :  { %15 = vsyncpa [#allocation5 + $0x1], 0  ;;  %s2025_s9 = smov 0   ;;  %s2027_s10 = smov 0  }
   0x8   :  { %s2029_s11 = smov 0   ;;  %s2031_s12 = smov 0  }
   0x9   :  { %s2033_s13 = smov 0   ;;  %s2035_s14 = smov 0  }
   0xa LB: > { %s1575_s15 = sadd.s32 4294967295, %s2001_s14   ;;  %s1576_s16 = sadd.s32 4294967294, %s2001_s14   ;;  %s2001_s14 = sphi %s2035_s14, %s21_s14   ;;  %s1997_s13 = sphi %s2033_s13, %s4228_s13   ;;  %s1993_s12 = sphi %s2031_s12, %s4227_s12   ;;  %s1989_s11 = sphi %s2029_s11, %s4226_s11   ;;  %s1985_s10 = sphi %s2027_s10, %s4225_s10   ;;  %s1981_s9 = sphi %s2025_s9, %s4224_s9  }
   0xb   : > { %s33_s17 = sadd.s32 1, %s1997_s13  ;;  %s42_s18 = sadd.s32 1, %s1989_s11 }
   0xc   : > { %p35_p0 = scmp.ge.s32.totalorder %s33_s17, 2  ;;  %p49_p1 = scmp.ne.s32.totalorder %s1989_s11, %s1985_s10 }
   0xd   : > { %p50_p2 = scmp.eq.s32.totalorder %s2001_s14, 0  ;;  %p55_p3 = scmp.ne.s32.totalorder %s1985_s10, %s1981_s9 }
   0xe   : > { %s4230_s17 = smov (%p35_p0, %s33_s17), 0  ;;  %p56_p5 = scmp.eq.s32.totalorder %s1575_s15, 0 }
   0xf   : > { %p2066_p4 = por %p50_p2, %p49_p1  ;;  %s39_s20 = ssub.s32 %s1997_s13, %s4230_s17 }
  0x10   : > { %p107_p6 = scmp.eq.s32.totalorder %s1575_s15, 1  ;;  %p40_p7 = scmp.eq.s32.totalorder %s39_s20, 0 }
  0x11   : > { %p2072_p8 = por %p56_p5, %p55_p3  ;;  %p113_p10 = scmp.eq.s32.totalorder %s1576_s16, 1 }
  0x12   : > { %p2076_p9 = por %p107_p6, %p49_p1  ;;  %p1615_p13 = scmp.lt.s32.totalorder %s2001_s14, 2 }
  0x13   : > { %s2081_s23 = scalar_select %p40_p7, %s1989_s11, %s42_s18  }
  0x14   : > { %p2083_p11 = por %p113_p10, %p55_p3  ;;  %s2090_s25 = sand.u32 1, %s1989_s11  }
  0x15   : > { %s1579_s26 = sshll.u32 %s2090_s25, 9  ;;  %s1595_s27 = sshll.u32 %s1997_s13, 11 }
  0x16   : > { %s3884_s0 = sld [smem:[#allocation75_spill]]  ;;  %s137_s3 = scalar_lea.vmem [#allocation3], %s1579_s26 }
  0x17   : > { %s145_s4 = sshll.u32 %s137_s3, 4  ;;  %p2099_p0 = pnand %p1615_p13, %p2066_p4  ;;  %s146_s4 = int_to_ptr.vmem [resolvable:$true] %s145_s4 }
  0x18   : > { %s134_s6 = scalar_lea.sflag [#allocation4], %s2090_s25  ;;  %s1874_s7 = scalar_lea.vmem %s146_s4, 8192 }
  0x19   : > { %p1863_p1 = pneg %p2099_p0  ;;  %p1875_p2 = scmp.ne.s32.totalorder %s146_s4, %s1874_s7 }
  0x1a   : > { %s2003_s8 = smov [#allocation3]  }
  0x1b   : > { %p1877_p3 = pnand %p1875_p2, %p1863_p1  ;;  %s1879_s15 = sshll.u32 %s2003_s8, 4  ;;  %s1880_s15 = int_to_ptr.vmem [resolvable:$false] %s1879_s15 }
  0x1c   : > { %s144_s30 = scalar_lea.hbm %s3884_s0, %s1595_s27  ;;  %s1881_s16 = scalar_lea.vmem %s1880_s15, 16384 }
  0x1d   : > { %p1878_p5 = pneg %p1877_p3  ;;  %p1882_p6 = scmp.lt.s32.totalorder %s146_s4, %s1880_s15 }
  0x1e   : > { %p1883_p4 = scmp.lt.s32.totalorder %s1881_s16, %s1874_s7 }
  0x20   : > { %p1884_p7 = por %p1883_p4, %p1882_p6 }
  0x22   : > { %p1885_p10 = pnand %p1884_p7, %p1878_p5 }
  0x24   : > { %1888 = shalt.err (!%p1885_p10)
}
  0x25   : > { %s2004_s18 = smov 4096   ;;  %s2005_s19 = smov 2048  }
  0x26   : > { %s2006_s20 = smov 128   ;;  %p1585_p13 = scmp.ge.s32.totalorder %s2001_s14, 1 }
  0x27   : > { %1607 = dma.hbm_to_vmem [thread:$0]  (!%p2099_p0), %s144_s30, 8192, %s146_s4, %s134_s6, %s2004_s18, %s2005_s19, %s2006_s20  }
  0x28   : > { %p173_p2 = scmp.lt.s32.totalorder %s2001_s14, 3  ;;  %s1582_s26 = sshll.u32 %s2090_s25, 4 }
  0x29   : > { %s1596_s28 = sshll.u32 %s1997_s13, 8  ;;  %s159_s29 = scalar_lea.vmem [#allocation6], %s1582_s26 }
  0x2a   : > { %p2114_p3 = pnand %p1585_p13, %p173_p2  ;;  %s168_s3 = sshll.u32 %s159_s29, 4  ;;  %s169_s3 = int_to_ptr.vmem [resolvable:$true] %s168_s3 }
  0x2b   : > { %s166_s15 = scalar_lea.hbm %s3804_s1, %s1596_s28  ;;  %s156_s16 = scalar_lea.sflag [#allocation7], %s2090_s25 }
  0x2c   : > { %s1902_s0 = scalar_lea.vmem %s169_s3, 256  ;;  %s2007_s30 = smov [#allocation6]  }
  0x2d   : > { %p1903_p5 = scmp.ne.s32.totalorder %s169_s3, %s1902_s0  ;;  %s1907_s4 = sshll.u32 %s2007_s30, 4  ;;  %s1908_s4 = int_to_ptr.vmem [resolvable:$false] %s1907_s4 }
  0x2e   : > { %s1909_s6 = scalar_lea.vmem %s1908_s4, 512  ;;  %p1910_p7 = scmp.lt.s32.totalorder %s169_s3, %s1908_s4 }
  0x2f   : > { %p1905_p6 = pnand %p1903_p5, %p1863_p1  ;;  %p1911_p10 = scmp.lt.s32.totalorder %s1909_s6, %s1902_s0 }
  0x31   : > { %p1906_p4 = pneg %p1905_p6  ;;  %p1912_p13 = por %p1911_p10, %p1910_p7 }
  0x33   : > { %p1913_p2 = pnand %p1912_p13, %p1906_p4 }
  0x35   : > { %1916 = shalt.err (!%p1913_p2)
}
  0x36   : > { %1610 = dma.hbm_to_vmem [thread:$0]  (!%p2099_p0), %s166_s15, 256, %s169_s3, %s156_s16  }
  0x37   : > { %177 = sbr.rel (%p2114_p3) target bundleno = 356 (0x164), region = 28 }
  0x3c   : > { %s2131_s25 = sand.u32 1, %s1985_s10  }
  0x3d   : > { %s1586_s18 = sshll.u32 %s2131_s25, 9  ;;  %s180_s19 = scalar_lea.sflag [#allocation4], %s2131_s25 }
  0x3e   : > { %s2135_s20 = scalar_lea.vmem [#allocation3], %s1586_s18 }
  0x3f   : > { %1968 = dma.done.wait (%p2072_p8), %s180_s19, 8192  }
  0x40   : > { %1970 = vsyncadd (%p2072_p8), %s180_s19, 4294959104  ;;  %s1587_s0 = sshll.u32 %s2131_s25, 4  ;;  %s189_s5 = scalar_lea.sflag [#allocation7], %s2131_s25 }
  0x41   : > { %s2145_s26 = scalar_lea.vmem [#allocation6], %s1587_s0 }
  0x42   : > { %1972 = dma.done.wait (%p2072_p8), %s189_s5, 256  }
  0x43   : > { %1974 = vsyncadd (%p2072_p8), %s189_s5, 4294967040  ;;  %v2152_v0 = vld [vmem:[%s2135_s20] sm:$0xff]  ;;  %v2155_v1 = vld [vmem:[%s2135_s20 + $0x8] sm:$0xff]  ;;  %v3806_v3 = vlaneseq  ;;  %s1589_s21 = sshll.u32 %s1993_s12, 11  ;;  %s1597_s27 = sshll.u32 %s1993_s12, 8 }
  0x44   : > { %3887 = vst [vmem:[#allocation12_spill] sm:$0xff] %v2152_v0  ;;  %3888 = vst [vmem:[#allocation13_spill] sm:$0xff] %v2155_v1  ;;  %v2158_v2 = vld [vmem:[%s2135_s20 + $0x10] sm:$0xff]  ;;  %v2161_v4 = vld [vmem:[%s2135_s20 + $0x80] sm:$0xff]  ;;  %s217_s28 = scalar_lea.vmem [#allocation8], %s1587_s0  ;;  %s1470_s8 = scalar_lea.hbm %s3805_s2, %s1597_s27 }
  0x45   : > { %3889 = vst [vmem:[#allocation14_spill] sm:$0xff] %v2158_v2  ;;  %v2164_v5 = vld [vmem:[%s2135_s20 + $0x88] sm:$0xff]  ;;  %v2167_v6 = vld [vmem:[%s2135_s20 + $0x90] sm:$0xff]  ;;  %v2170_v7 = vld [vmem:[%s2135_s20 + $0x18] sm:$0xff]  ;;  %v2188_v13 = vshrl.u32 %v3806_v3, 7  ;;  %v635_v14 = vmin.f32 %v2152_v0, %v2161_v4  ;;  %s1472_s29 = sshll.u32 %s217_s28, 4  ;;  %s1473_s29 = int_to_ptr.vmem [resolvable:$true] %s1472_s29 }
  0x46   : > { %3890 = vst [vmem:[#allocation15_spill] sm:$0xff] %v2170_v7  ;;  %v2173_v8 = vld [vmem:[%s2135_s20 + $0x20] sm:$0xff]  ;;  %v2176_v9 = vld [vmem:[%s2135_s20 + $0x28] sm:$0xff]  ;;  %v2179_v10 = vld [vmem:[%s2135_s20 + $0x98] sm:$0xff]  ;;  %v644_v15 = vmin.f32 %v2155_v1, %v2164_v5  ;;  %v653_v16 = vmin.f32 %v2158_v2, %v2167_v6  ;;  %s1458_s15 = scalar_lea.sflag [#allocation5], %s2131_s25  ;;  %s1917_s16 = scalar_lea.vmem %s1473_s29, 256 }
  0x47   : > { %3891 = vst [vmem:[#allocation16_spill] sm:$0xff] %v2173_v8  ;;  %3892 = vst [vmem:[#allocation17_spill] sm:$0xff] %v2176_v9  ;;  %v2182_v11 = vld [vmem:[%s2135_s20 + $0xa0] sm:$0xff]  ;;  %v2185_v12 = vld [vmem:[%s2135_s20 + $0xa8] sm:$0xff]  ;;  %v2212_v22 = vadd.s32 8, %v2188_v13  ;;  %v2215_v23 = vadd.s32 16, %v2188_v13  ;;  %v662_v27 = vmin.f32 %v2170_v7, %v2179_v10  ;;  %p1918_p8 = scmp.ne.s32.totalorder %s1473_s29, %s1917_s16 }
  0x48   : > { %3893 = vst [vmem:[#allocation18_spill] sm:$0xff] %v2188_v13  ;;  %v2197_v17 = vld [vmem:[%s2135_s20 + $0x100] sm:$0xff]  ;;  %v2200_v18 = vld [vmem:[%s2135_s20 + $0x108] sm:$0xff]  ;;  %v2203_v19 = vld [vmem:[%s2135_s20 + $0x110] sm:$0xff]  ;;  %v2224_v26 = vadd.s32 24, %v2188_v13  ;;  %v671_v28 = vmin.f32 %v2173_v8, %v2182_v11  ;;  %v680_v29 = vmin.f32 %v2176_v9, %v2185_v12  ;;  %s2009_s12 = smov [#allocation8]  }
  0x49   : > { %3894 = vst [vmem:[#allocation19_spill] sm:$0xff] %v2197_v17  ;;  %3895 = vst [vmem:[#allocation20_spill] sm:$0xff] %v2200_v18  ;;  %v2206_v20 = vld [vmem:[%s2135_s20 + $0x30] sm:$0xff]  ;;  %v2218_v24 = vld [vmem:[%s2135_s20 + $0x38] sm:$0xff]  ;;  %v636_v40 = vmin.f32 %v635_v14, %v2197_v17  ;;  %v645_v41 = vmin.f32 %v644_v15, %v2200_v18  ;;  %v654_v42 = vmin.f32 %v653_v16, %v2203_v19  ;;  %p1919_p0 = pnand %p1918_p8, %p2076_p9  ;;  %s1921_s30 = sshll.u32 %s2009_s12, 4  ;;  %s1922_s30 = int_to_ptr.vmem [resolvable:$false] %s1921_s30 }
  0x4a   : > { %3896 = vst [vmem:[#allocation21_spill] sm:$0xff] %v2203_v19  ;;  %3897 = vst [vmem:[#allocation22_spill] sm:$0xff] %v2206_v20  ;;  %v2209_v21 = vld [vmem:[%s2135_s20 + $0xb0] sm:$0xff]  ;;  %v2221_v25 = vld [vmem:[%s2135_s20 + $0xb8] sm:$0xff]  ;;  %s1923_s4 = scalar_lea.vmem %s1922_s30, 512  ;;  %p1924_p3 = scmp.lt.s32.totalorder %s1473_s29, %s1922_s30 }
  0x4b   : > { %3898 = vst [vmem:[#allocation23_spill] sm:$0xff] %v2209_v21  ;;  %3899 = vst [vmem:[#allocation24_spill] sm:$0xff] %v2218_v24  ;;  %v2233_v30 = vld [vmem:[%s2135_s20 + $0x40] sm:$0xff]  ;;  %v2236_v31 = vld [vmem:[%s2135_s20 + $0x48] sm:$0xff]  ;;  %v689_v53 = vmin.f32 %v2206_v20, %v2209_v21  ;;  %p1920_p1 = pneg %p1919_p0  ;;  %p1925_p5 = scmp.lt.s32.totalorder %s1923_s4, %s1917_s16 }
  0x4c   : > { %3900 = vst [vmem:[#allocation25_spill] sm:$0xff] %v2221_v25  ;;  %3901 = vst [vmem:[#allocation26_spill] sm:$0xff] %v2233_v30  ;;  %v2239_v32 = vld [vmem:[%s2135_s20 + $0x50] sm:$0xff]  ;;  %v2242_v33 = vld [vmem:[%s2135_s20 + $0xc0] sm:$0xff] }
  0x4d   : > { %3902 = vst [vmem:[#allocation27_spill] sm:$0xff] %v2236_v31  ;;  %3903 = vst [vmem:[#allocation28_spill] sm:$0xff] %v2239_v32  ;;  %v2245_v34 = vld [vmem:[%s2135_s20 + $0xc8] sm:$0xff]  ;;  %v2248_v35 = vld [vmem:[%s2135_s20 + $0xd0] sm:$0xff]  ;;  %p1926_p6 = por %p1925_p5, %p1924_p3 }
  0x4e   : > { %3904 = vst [vmem:[#allocation29_spill] sm:$0xff] %v2242_v33  ;;  %3905 = vst [vmem:[#allocation30_spill] sm:$0xff] %v2245_v34  ;;  %v2251_v36 = vld [vmem:[%s2135_s20 + $0x118] sm:$0xff]  ;;  %v2254_v37 = vld [vmem:[%s2135_s20 + $0x120] sm:$0xff] }
  0x4f   : > { %3906 = vst [vmem:[#allocation31_spill] sm:$0xff] %v2248_v35  ;;  %3907 = vst [vmem:[#allocation32_spill] sm:$0xff] %v2251_v36  ;;  %v2257_v38 = vld [vmem:[%s2135_s20 + $0x128] sm:$0xff]  ;;  %v2264_v43 = vld [vmem:[%s2135_s20 + $0x58] sm:$0xff]  ;;  %v663_v15 = vmin.f32 %v662_v27, %v2251_v36  ;;  %v672_v16 = vmin.f32 %v671_v28, %v2254_v37  ;;  %v698_v27 = vmin.f32 %v2218_v24, %v2221_v25  ;;  %p1927_p4 = pnand %p1926_p6, %p1920_p1 }
  0x50   : > { %3908 = vst [vmem:[#allocation33_spill] sm:$0xff] %v2254_v37  ;;  %3909 = vst [vmem:[#allocation34_spill] sm:$0xff] %v2257_v38  ;;  %v2267_v44 = vld [vmem:[%s2135_s20 + $0x60] sm:$0xff]  ;;  %v2270_v45 = vld [vmem:[%s2135_s20 + $0x68] sm:$0xff]  ;;  %v681_v3 = vmin.f32 %v680_v29, %v2257_v38 }
  0x51   : > { %3910 = vst [vmem:[#allocation35_spill] sm:$0xff] %v2264_v43  ;;  %3911 = vst [vmem:[#allocation36_spill] sm:$0xff] %v2267_v44  ;;  %v2273_v46 = vld [vmem:[%s2135_s20 + $0x70] sm:$0xff]  ;;  %v2276_v47 = vld [vmem:[%s2135_s20 + $0x180] sm:$0xff] }
  0x52   : > { %3912 = vst [vmem:[#allocation37_spill] sm:$0xff] %v2270_v45  ;;  %3913 = vst [vmem:[#allocation38_spill] sm:$0xff] %v2273_v46  ;;  %v2279_v48 = vld [vmem:[%s2135_s20 + $0x188] sm:$0xff]  ;;  %v2282_v49 = vld [vmem:[%s2135_s20 + $0x190] sm:$0xff]  ;;  %v637_v52 = vmin.f32 %v636_v40, %v2276_v47  ;;  %v707_v40 = vmin.f32 %v2233_v30, %v2242_v33 }
  0x53   : > { %3914 = vst [vmem:[#allocation39_spill] sm:$0xff] %v2276_v47  ;;  %3915 = vst [vmem:[#allocation40_spill] sm:$0xff] %v2279_v48  ;;  %v2290_v54 = vld [vmem:[%s2135_s20 + $0x78] sm:$0xff]  ;;  %v2296_v56 = vld [vmem:[%s2135_s20 + $0xe0] sm:$0xff]  ;;  %v646_v51 = vmin.f32 %v645_v41, %v2279_v48  ;;  %v655_v14 = vmin.f32 %v654_v42, %v2282_v49  ;;  %v716_v41 = vmin.f32 %v2236_v31, %v2245_v34 }
  0x54   : > { %3916 = vst [vmem:[#allocation41_spill] sm:$0xff] %v2282_v49  ;;  %3917 = vst [vmem:[#allocation42_spill] sm:$0xff] %v2290_v54  ;;  %v2293_v55 = vld [vmem:[%s2135_s20 + $0xd8] sm:$0xff]  ;;  %v2299_v57 = vld [vmem:[%s2135_s20 + $0x130] sm:$0xff]  ;;  %v725_v42 = vmin.f32 %v2239_v32, %v2248_v35  ;;  %v638_v35 = vrot.slane %v637_v52, 4 }
  0x55   : > { %3918 = vst [vmem:[#allocation43_spill] sm:$0xff] %v2293_v55  ;;  %3919 = vst [vmem:[#allocation44_spill] sm:$0xff] %v2296_v56  ;;  %v2305_v61 = vld [vmem:[%s2135_s20 + $0xe8] sm:$0xff]  ;;  %v2308_v62 = vld [vmem:[%s2135_s20 + $0xf0] sm:$0xff]  ;;  %v690_v39 = vmin.f32 %v689_v53, %v2299_v57  ;;  %v734_v38 = vmin.f32 %v2264_v43, %v2293_v55  ;;  %v743_v53 = vmin.f32 %v2267_v44, %v2296_v56  ;;  %v647_v34 = vrot.slane %v646_v51, 4 }
  0x56   : > { %3920 = vst [vmem:[#allocation45_spill] sm:$0xff] %v2299_v57  ;;  %3921 = vst [vmem:[#allocation46_spill] sm:$0xff] %v2305_v61  ;;  %v2311_v63 = vld [vmem:[%s2135_s20 + $0xf8] sm:$0xff]  ;;  %v2321_v60 = vld [vmem:[%s2135_s20 + $0x1a0] sm:$0xff]  ;;  %v752_v57 = vmin.f32 %v2270_v45, %v2305_v61  ;;  %v761_v37 = vmin.f32 %v2273_v46, %v2308_v62  ;;  %v656_v33 = vrot.slane %v655_v14, 4 }
  0x57   : > { %3922 = vst [vmem:[#allocation47_spill] sm:$0xff] %v2308_v62  ;;  %3923 = vst [vmem:[#allocation48_spill] sm:$0xff] %v2311_v63  ;;  %v2318_v59 = vld [vmem:[%s2135_s20 + $0x198] sm:$0xff]  ;;  %v2324_v58 = vld [vmem:[%s2135_s20 + $0x1a8] sm:$0xff]  ;;  %v2377_v55 = vmin.f32 %v672_v16, %v2321_v60  ;;  %v770_v61 = vmin.f32 %v2290_v54, %v2311_v63 }
  0x58   : > { %3924 = vst [vmem:[#allocation49_spill] sm:$0xff] %v2318_v59  ;;  %3925 = vst [vmem:[#allocation50_spill] sm:$0xff] %v2321_v60  ;;  %v2332_v28 = vld [vmem:[%s2135_s20 + $0x138] sm:$0xff]  ;;  %v2335_v29 = vld [vmem:[%s2135_s20 + $0x140] sm:$0xff]  ;;  %v2374_v17 = vmin.f32 %v663_v15, %v2318_v59  ;;  %v2380_v56 = vmin.f32 %v681_v3, %v2324_v58 }
  0x59   : > { %3926 = vst [vmem:[#allocation51_spill] sm:$0xff] %v2324_v58  ;;  %3927 = vst [vmem:[#allocation52_spill] sm:$0xff] %v2332_v28  ;;  %v2338_v50 = vld [vmem:[%s2135_s20 + $0x148] sm:$0xff]  ;;  %v2348_v49 = vld [vmem:[%s2135_s20 + $0x150] sm:$0xff]  ;;  %v699_v25 = vmin.f32 %v698_v27, %v2332_v28  ;;  %v2395_v16 = vmin.f32 %v707_v40, %v2335_v29 }
  0x5a   : > { %v2351_v48 = vld [vmem:[%s2135_s20 + $0x158] sm:$0xff]  ;;  %v2354_v47 = vld [vmem:[%s2135_s20 + $0x1b0] sm:$0xff]  ;;  %v2365_v36 = vld [vmem:[%s2135_s20 + $0x160] sm:$0xff]  ;;  %3928 = vst [vmem:[#allocation53_spill] sm:$0xff] %v2374_v17  ;;  %v2398_v3 = vmin.f32 %v716_v41, %v2338_v50  ;;  %v2401_v58 = vmin.f32 %v725_v42, %v2348_v49  ;;  %v3945_v41 = vsub.s32 1, %v2188_v13  ;;  %v3958_v17 = vsub.s32 6, %v2188_v13 }
  0x5b   : > { %v2368_v19 = vld [vmem:[%s2135_s20 + $0x168] sm:$0xff]  ;;  %v2371_v18 = vld [vmem:[%s2135_s20 + $0x170] sm:$0xff]  ;;  %3929 = vst [vmem:[#allocation54_spill] sm:$0xff] %v2377_v55  ;;  %3930 = vst [vmem:[#allocation55_spill] sm:$0xff] %v2380_v56  ;;  %v2392_v15 = vmin.f32 %v690_v39, %v2354_v47  ;;  %v2405_v59 = vmin.f32 %v734_v38, %v2351_v48  ;;  %v2408_v27 = vmin.f32 %v743_v53, %v2365_v36  ;;  %v3956_v55 = vsub.s32 4, %v2188_v13 }
  0x5c   : > { %v2385_v62 = vld [vmem:[%s2135_s20 + $0x178] sm:$0xff]  ;;  %3932 = vst [vmem:[#allocation57_spill] sm:$0xff] %v2395_v16  ;;  %3933 = vst [vmem:[#allocation58_spill] sm:$0xff] %v2398_v3  ;;  %v292_v60 = vld [vmem:[%s2145_s26] sm:$0xff]  ;;  %v2411_v28 = vmin.f32 %v752_v57, %v2368_v19  ;;  %v2414_v39 = vmin.f32 %v761_v37, %v2371_v18  ;;  %v2425_v53 = vmin.f32 %v646_v51, %v647_v34  ;;  %v3944_v37 = vsub.s32 0, %v2188_v13 }
  0x5d   : > { %v2389_v21 = vld [vmem:[%s2135_s20 + $0x1b8] sm:$0xff]  ;;  %3931 = vst [vmem:[#allocation56_spill] sm:$0xff] %v2392_v15  ;;  %3934 = vst [vmem:[#allocation59_spill] sm:$0xff] %v2401_v58  ;;  %v2420_v58 = vmin.f32 %v770_v61, %v2385_v62  ;;  %v2438_v42 = vrot.slane %v292_v60, %v3945_v41  ;;  %v3946_v61 = vsub.s32 2, %v2188_v13  ;;  %v3950_v41 = vsub.s32 6, %v2188_v13  ;;  %v3992_v3 = vld [vmem:[#allocation46_spill] sm:$0xff] }
  0x5e   : > { %3935 = vst [vmem:[#allocation60_spill] sm:$0xff] %v2405_v59  ;;  %3936 = vst [vmem:[#allocation61_spill] sm:$0xff] %v2408_v27  ;;  %v293_v38 = vld [vmem:[%s2145_s26 + $0x8] sm:$0xff]  ;;  %v2423_v59 = vmin.f32 %v637_v52, %v638_v35  ;;  %v2427_v27 = vmin.f32 %v655_v14, %v656_v33  ;;  %v2430_v57 = vmin.f32 %v699_v25, %v2389_v21  ;;  %v3947_v33 = vsub.s32 3, %v2188_v13 }
  0x5f   : > { %3937 = vst [vmem:[#allocation62_spill] sm:$0xff] %v2411_v28  ;;  %3938 = vst [vmem:[#allocation63_spill] sm:$0xff] %v2414_v39  ;;  %v2434_v40 = vrot.slane %v292_v60, %v3944_v37  ;;  %v2442_v56 = vrot.slane %v292_v60, %v3946_v61  ;;  %v3948_v25 = vsub.s32 4, %v2188_v13  ;;  %v3949_v52 = vsub.s32 5, %v2188_v13  ;;  %v3989_v28 = vld [vmem:[#allocation44_spill] sm:$0xff]  ;;  %v3995_v16 = vld [vmem:[#allocation47_spill] sm:$0xff] }
  0x60   : > { %3939 = vst [vmem:[#allocation64_spill] sm:$0xff] %v2420_v58  ;;  %3940 = vst [vmem:[#allocation65_spill] sm:$0xff] %v2423_v59  ;;  %v2447_v35 = vrot.slane %v292_v60, %v3947_v33  ;;  %v2459_v37 = vrot.slane %v292_v60, %v3950_v41  ;;  %v3951_v61 = vsub.s32 7, %v2188_v13  ;;  %v3952_v34 = vsub.s32 0, %v2188_v13  ;;  %v3985_v58 = vld [vmem:[#allocation31_spill] sm:$0xff] }
  0x61   : > { %3941 = vst [vmem:[#allocation66_spill] sm:$0xff] %v2425_v53  ;;  %3942 = vst [vmem:[#allocation67_spill] sm:$0xff] %v2427_v27  ;;  %v2451_v51 = vrot.slane %v292_v60, %v3948_v25  ;;  %v2455_v14 = vrot.slane %v292_v60, %v3949_v52  ;;  %v3953_v53 = vsub.s32 1, %v2188_v13  ;;  %v3954_v59 = vsub.s32 2, %v2188_v13 }
  0x62   : > { %3943 = vst [vmem:[#allocation68_spill] sm:$0xff] %v2430_v57  ;;  %v2463_v27 = vrot.slane %v292_v60, %v3951_v61  ;;  %v2467_v33 = vrot.slane %v293_v38, %v3952_v34  ;;  %v3955_v15 = vsub.s32 3, %v2188_v13  ;;  %v2483_v60 = vrot.slane %v293_v38, %v3956_v55 }
  0x63   : > { %v2471_v25 = vrot.slane %v293_v38, %v3953_v53  ;;  %v2475_v52 = vrot.slane %v293_v38, %v3954_v59  ;;  %v3957_v61 = vsub.s32 5, %v2188_v13  ;;  %v2491_v53 = vrot.slane %v293_v38, %v3958_v17 }
  0x64   : > { %v2479_v41 = vrot.slane %v293_v38, %v3955_v15  ;;  %v3959_v57 = vsub.s32 7, %v2188_v13  ;;  %vm363_vm0 = vcmp.eq.s32.totalorder %v2188_v13, %v2434_v40  ;;  %vm364_vm1 = vcmp.eq.s32.totalorder %v2188_v13, %v2438_v42 }
  0x65   : > { %v2487_v34 = vrot.slane %v293_v38, %v3957_v61  ;;  %vm365_vm2 = vcmp.eq.s32.totalorder %v2188_v13, %v2442_v56  ;;  %vm366_vm3 = vcmp.eq.s32.totalorder %v2188_v13, %v2447_v35  ;;  %vm367_vm4 = vcmp.eq.s32.totalorder %v2188_v13, %v2451_v51 }
  0x66   : > { %v2495_v59 = vrot.slane %v293_v38, %v3959_v57  ;;  %vm368_vm5 = vcmp.eq.s32.totalorder %v2188_v13, %v2455_v14  ;;  %vm369_vm6 = vcmp.eq.s32.totalorder %v2188_v13, %v2459_v37  ;;  %vm370_vm7 = vcmp.eq.s32.totalorder %v2188_v13, %v2463_v27 }
  0x67   : > { %vm371_vm8 = vcmp.eq.s32.totalorder %v2188_v13, %v2467_v33  ;;  %vm403_vm12 = vcmp.eq.s32.totalorder %v2215_v23, %v2467_v33  ;;  %vm404_vm13 = vcmp.eq.s32.totalorder %v2215_v23, %v2471_v25  ;;  %vm405_vm14 = vcmp.eq.s32.totalorder %v2215_v23, %v2475_v52 }
  0x68   : > { %vm406_vm15 = vcmp.eq.s32.totalorder %v2215_v23, %v2479_v41  ;;  %v2595_v17 = vsel %vm363_vm0, %v2152_v0, 0.0  ;;  %v2601_v55 = vsel %vm364_vm1, %v2155_v1, 0.0  ;;  %v2607_v15 = vsel %vm365_vm2, %v2158_v2, 0.0 }
  0x69   : > { %vm410_vm11 = vcmp.eq.s32.totalorder %v2215_v23, %v2495_v59  ;;  %vm411_vm10 = vcmp.eq.s32.totalorder %v2224_v26, %v2434_v40  ;;  %vm412_vm0 = vcmp.eq.s32.totalorder %v2224_v26, %v2438_v42  ;;  %vm413_vm9 = vcmp.eq.s32.totalorder %v2224_v26, %v2442_v56 }
  0x6a   : > { %v2621_v38 = vsel %vm366_vm3, %v2170_v7, 0.0  ;;  %v2627_v57 = vsel %vm367_vm4, %v2173_v8, 0.0  ;;  %v2633_v61 = vsel %vm368_vm5, %v2176_v9, 0.0  ;;  %v2639_v2 = vsel %vm369_vm6, %v2206_v20, 0.0 }
  0x6b   : > { %vm414_vm1 = vcmp.eq.s32.totalorder %v2224_v26, %v2447_v35  ;;  %vm415_vm2 = vcmp.eq.s32.totalorder %v2224_v26, %v2451_v51  ;;  %v2651_v9 = vsel %vm370_vm7, %v2218_v24, 0.0  ;;  %v2657_v20 = vsel %vm371_vm8, %v2233_v30, 0.0 }
  0x6c   : > { %vm3960_vm4 = vcmp.eq.s32.totalorder %v2188_v13, %v2471_v25  ;;  %vm3961_vm5 = vcmp.eq.s32.totalorder %v2188_v13, %v2475_v52  ;;  %vm3962_vm7 = vcmp.eq.s32.totalorder %v2188_v13, %v2479_v41  ;;  %vm3963_vm8 = vcmp.eq.s32.totalorder %v2188_v13, %v2483_v60 }
  0x6d   : > { %v2663_v8 = vsel %vm3960_vm4, %v2236_v31, 0.0  ;;  %v2669_v7 = vsel %vm3961_vm5, %v2239_v32, 0.0  ;;  %v2677_v30 = vsel %vm3962_vm7, %v2264_v43, 0.0  ;;  %v2683_v31 = vsel %vm3963_vm8, %v2267_v44, 0.0 }
  0x6e   : > { %3964 = vst [vmem:[#allocation69_spill] sm:$0xff] %v2683_v31  ;;  %vm3965_vm4 = vcmp.eq.s32.totalorder %v2188_v13, %v2487_v34  ;;  %vm3967_vm5 = vcmp.eq.s32.totalorder %v2188_v13, %v2491_v53  ;;  %vm3969_vm8 = vcmp.eq.s32.totalorder %v2188_v13, %v2495_v59  ;;  %vm3972_vm6 = vcmp.eq.s32.totalorder %v2212_v22, %v2438_v42  ;;  %v3977_v13 = vld [vmem:[#allocation23_spill] sm:$0xff]  ;;  %v4014_v31 = vld [vmem:[#allocation52_spill] sm:$0xff] }
  0x6f   : > { %v2689_v32 = vsel %vm3965_vm4, %v2270_v45, 0.0  ;;  %v2695_v24 = vsel %vm3967_vm5, %v2273_v46, 0.0  ;;  %v2703_v44 = vsel %vm3969_vm8, %v2290_v54, 0.0  ;;  %vm3971_vm4 = vcmp.eq.s32.totalorder %v2212_v22, %v2434_v40 }
  0x70   : > { %3966 = vst [vmem:[#allocation70_spill] sm:$0xff] %v2689_v32  ;;  %3968 = vst [vmem:[#allocation71_spill] sm:$0xff] %v2695_v24  ;;  %v443_v45 = vsel %vm3971_vm4, %v2161_v4, 0.0  ;;  %v444_v46 = vsel %vm3972_vm6, %v2164_v5, 0.0  ;;  %vm3973_vm5 = vcmp.eq.s32.totalorder %v2212_v22, %v2442_v56  ;;  %vm3974_vm4 = vcmp.eq.s32.totalorder %v2212_v22, %v2447_v35  ;;  %v4002_v24 = vld [vmem:[#allocation20_spill] sm:$0xff] }
  0x71   : > { %3970 = vst [vmem:[#allocation72_spill] sm:$0xff] %v2703_v44  ;;  %v445_v43 = vsel %vm3973_vm5, %v2167_v6, 0.0  ;;  %v446_v4 = vsel %vm3974_vm4, %v2179_v10, 0.0  ;;  %vm3975_vm6 = vcmp.eq.s32.totalorder %v2212_v22, %v2451_v51  ;;  %vm3976_vm5 = vcmp.eq.s32.totalorder %v2212_v22, %v2455_v14  ;;  %v3979_v10 = vld [vmem:[#allocation25_spill] sm:$0xff]  ;;  %v4006_v32 = vld [vmem:[#allocation32_spill] sm:$0xff] }
  0x72   : > { %v447_v5 = vsel %vm3975_vm6, %v2182_v11, 0.0  ;;  %v448_v6 = vsel %vm3976_vm5, %v2185_v12, 0.0  ;;  %vm3978_vm8 = vcmp.eq.s32.totalorder %v2212_v22, %v2459_v37  ;;  %vm422_vm3 = vcmp.eq.s32.totalorder %v2224_v26, %v2479_v41  ;;  %v3981_v12 = vld [vmem:[#allocation29_spill] sm:$0xff] }
  0x73   : > { %v449_v54 = vsel %vm3978_vm8, %v3977_v13, 0.0  ;;  %vm3980_vm6 = vcmp.eq.s32.totalorder %v2212_v22, %v2463_v27  ;;  %vm3982_vm5 = vcmp.eq.s32.totalorder %v2212_v22, %v2467_v33  ;;  %v3983_v13 = vld [vmem:[#allocation30_spill] sm:$0xff]  ;;  %vm3984_vm8 = vcmp.eq.s32.totalorder %v2212_v22, %v2471_v25 }
  0x74   : > { %v450_v11 = vsel %vm3980_vm6, %v3979_v10, 0.0  ;;  %v2753_v1 = vsel %vm3982_vm5, %v3981_v12, 0.0  ;;  %v2759_v0 = vsel %vm3984_vm8, %v3983_v13, 0.0  ;;  %vm3986_vm7 = vcmp.eq.s32.totalorder %v2212_v22, %v2475_v52  ;;  %v3987_v10 = vld [vmem:[#allocation43_spill] sm:$0xff] }
  0x75   : > { %v2765_v39 = vsel %vm3986_vm7, %v3985_v58, 0.0  ;;  %vm3988_vm5 = vcmp.eq.s32.totalorder %v2212_v22, %v2479_v41  ;;  %vm3990_vm8 = vcmp.eq.s32.totalorder %v2212_v22, %v2483_v60  ;;  %vm3993_vm7 = vcmp.eq.s32.totalorder %v2212_v22, %v2487_v34 }
  0x76   : > { %v2773_v12 = vsel %vm3988_vm5, %v3987_v10, 0.0  ;;  %v2779_v13 = vsel %vm3990_vm8, %v3989_v28, 0.0  ;;  %v2785_v58 = vsel %vm3993_vm7, %v3992_v3, 0.0  ;;  %vm3996_vm6 = vcmp.eq.s32.totalorder %v2212_v22, %v2491_v53  ;;  %v4000_v10 = vld [vmem:[#allocation19_spill] sm:$0xff] }
  0x77   : > { %3991 = vst [vmem:[#allocation23_spill] sm:$0xff] %v2779_v13  ;;  %3994 = vst [vmem:[#allocation25_spill] sm:$0xff] %v2785_v58  ;;  %v2791_v44 = vsel %vm3996_vm6, %v3995_v16, 0.0  ;;  %vm3998_vm8 = vcmp.eq.s32.totalorder %v2212_v22, %v2495_v59  ;;  %vm4001_vm7 = vcmp.eq.s32.totalorder %v2215_v23, %v2434_v40  ;;  %vm4003_vm4 = vcmp.eq.s32.totalorder %v2215_v23, %v2438_v42  ;;  %v4012_v13 = vld [vmem:[#allocation45_spill] sm:$0xff] }
  0x78   : > { %3997 = vst [vmem:[#allocation73_spill] sm:$0xff] %v2791_v44  ;;  %v2799_v28 = vsel %vm3998_vm8, %v2311_v63, 0.0  ;;  %v459_v3 = vsel %vm4001_vm7, %v4000_v10, 0.0  ;;  %v460_v16 = vsel %vm4003_vm4, %v4002_v24, 0.0  ;;  %v4004_v44 = vld [vmem:[#allocation21_spill] sm:$0xff]  ;;  %vm4005_vm6 = vcmp.eq.s32.totalorder %v2215_v23, %v2442_v56 }
  0x79   : > { %3999 = vst [vmem:[#allocation74_spill] sm:$0xff] %v2799_v28  ;;  %v461_v58 = vsel %vm4005_vm6, %v4004_v44, 0.0  ;;  %vm4007_vm8 = vcmp.eq.s32.totalorder %v2215_v23, %v2447_v35  ;;  %v4008_v63 = vld [vmem:[#allocation33_spill] sm:$0xff]  ;;  %vm4009_vm5 = vcmp.eq.s32.totalorder %v2215_v23, %v2451_v51  ;;  %v4010_v28 = vld [vmem:[#allocation34_spill] sm:$0xff]  ;;  %vm4011_vm7 = vcmp.eq.s32.totalorder %v2215_v23, %v2455_v14 }
  0x7a   : > { %v462_v22 = vsel %vm4007_vm8, %v4006_v32, 0.0  ;;  %v463_v10 = vsel %vm4009_vm5, %v4008_v63, 0.0  ;;  %v464_v24 = vsel %vm4011_vm7, %v4010_v28, 0.0  ;;  %vm4013_vm4 = vcmp.eq.s32.totalorder %v2215_v23, %v2459_v37 }
  0x7b   : > { %v465_v44 = vsel %vm4013_vm4, %v4012_v13, 0.0  ;;  %vm4015_vm6 = vcmp.eq.s32.totalorder %v2215_v23, %v2463_v27  ;;  %v2837_v63 = vsel %vm403_vm12, %v2335_v29, 0.0  ;;  %v2843_v28 = vsel %vm404_vm13, %v2338_v50, 0.0  ;;  %v4023_v50 = vld [vmem:[#allocation39_spill] sm:$0xff] }
  0x7c   : > { %v466_v32 = vsel %vm4015_vm6, %v4014_v31, 0.0  ;;  %v2849_v13 = vsel %vm405_vm14, %v2348_v49, 0.0  ;;  %v2855_v31 = vsel %vm406_vm15, %v2351_v48, 0.0  ;;  %vm4017_vm12 = vcmp.eq.s32.totalorder %v2215_v23, %v2483_v60 }
  0x7d   : > { %4016 = vst [vmem:[#allocation19_spill] sm:$0xff] %v2855_v31  ;;  %v2861_v29 = vsel %vm4017_vm12, %v2365_v36, 0.0  ;;  %vm4019_vm13 = vcmp.eq.s32.totalorder %v2215_v23, %v2487_v34  ;;  %vm4021_vm14 = vcmp.eq.s32.totalorder %v2215_v23, %v2491_v53  ;;  %v2879_v36 = vsel %vm410_vm11, %v2385_v62, 0.0  ;;  %v4025_v31 = vld [vmem:[#allocation41_spill] sm:$0xff]  ;;  %v4027_v62 = vld [vmem:[#allocation50_spill] sm:$0xff] }
  0x7e   : > { %4018 = vst [vmem:[#allocation20_spill] sm:$0xff] %v2861_v29  ;;  %v2867_v49 = vsel %vm4019_vm13, %v2368_v19, 0.0  ;;  %v2873_v48 = vsel %vm4021_vm14, %v2371_v18, 0.0  ;;  %v475_v29 = vsel %vm411_vm10, %v4023_v50, 0.0  ;;  %v4024_v19 = vld [vmem:[#allocation40_spill] sm:$0xff]  ;;  %v477_v18 = vsel %vm413_vm9, %v4025_v31, 0.0 }
  0x7f   : > { %4020 = vst [vmem:[#allocation21_spill] sm:$0xff] %v2867_v49  ;;  %4022 = vst [vmem:[#allocation32_spill] sm:$0xff] %v2873_v48  ;;  %v476_v49 = vsel %vm412_vm0, %v4024_v19, 0.0  ;;  %v4026_v48 = vld [vmem:[#allocation49_spill] sm:$0xff]  ;;  %v479_v40 = vsel %vm415_vm2, %v4027_v62, 0.0  ;;  %v4028_v50 = vld [vmem:[#allocation51_spill] sm:$0xff]  ;;  %vm4029_vm10 = vcmp.eq.s32.totalorder %v2224_v26, %v2455_v14  ;;  %v491_v56 = vadd.f32 %v443_v45, %v2595_v17 }
  0x80   : > { %v478_v23 = vsel %vm414_vm1, %v4026_v48, 0.0  ;;  %v480_v42 = vsel %vm4029_vm10, %v4028_v50, 0.0  ;;  %vm4030_vm9 = vcmp.eq.s32.totalorder %v2224_v26, %v2459_v37  ;;  %v500_v31 = vadd.f32 %v444_v46, %v2601_v55  ;;  %v2914_v19 = vld [vmem:[%s2135_s20 + $0x1c0] sm:$0xff]  ;;  %v2917_v62 = vld [vmem:[%s2135_s20 + $0x1c8] sm:$0xff]  ;;  %v2920_v14 = vld [vmem:[%s2135_s20 + $0x1d0] sm:$0xff] }
  0x81   : > { %v481_v35 = vsel %vm4030_vm9, %v2354_v47, 0.0  ;;  %v509_v48 = vadd.f32 %v445_v43, %v2607_v15  ;;  %v518_v51 = vadd.f32 %v446_v4, %v2621_v38  ;;  %vm4031_vm11 = vcmp.eq.s32.totalorder %v2224_v26, %v2463_v27  ;;  %v2930_v37 = vld [vmem:[%s2135_s20 + $0x1d8] sm:$0xff]  ;;  %v2933_v17 = vld [vmem:[%s2135_s20 + $0x1e0] sm:$0xff]  ;;  %v2936_v55 = vld [vmem:[%s2135_s20 + $0x1e8] sm:$0xff] }
  0x82   : > { %v482_v45 = vsel %vm4031_vm11, %v2389_v21, 0.0  ;;  %v527_v47 = vadd.f32 %v447_v5, %v2627_v57  ;;  %v536_v46 = vadd.f32 %v448_v6, %v2633_v61  ;;  %v545_v43 = vadd.f32 %v449_v54, %v2639_v2  ;;  %v2952_v27 = vld [vmem:[%s2135_s20 + $0x1f0] sm:$0xff]  ;;  %v2967_v57 = vld [vmem:[%s2135_s20 + $0x1f8] sm:$0xff] }
  0x83   : > { %vm4032_vm15 = vcmp.eq.s32.totalorder %v2224_v26, %v2467_v33  ;;  %vm4033_vm0 = vcmp.eq.s32.totalorder %v2224_v26, %v2471_v25  ;;  %vm4034_vm1 = vcmp.eq.s32.totalorder %v2224_v26, %v2475_v52  ;;  %v554_v54 = vadd.f32 %v450_v11, %v2651_v9  ;;  %4035 = vst [vmem:[#allocation33_spill] sm:$0xff] %v2952_v27 }
  0x84   : > { %v483_v15 = vsel %vm4032_vm15, %v2914_v19, 0.0  ;;  %v484_v21 = vsel %vm4033_vm0, %v2917_v62, 0.0  ;;  %v485_v2 = vsel %vm4034_vm1, %v2920_v14, 0.0  ;;  %v486_v33 = vsel %vm422_vm3, %v2930_v37, 0.0  ;;  %4038 = vst [vmem:[#allocation34_spill] sm:$0xff] %v2967_v57 }
  0x85   : > { %vm4036_vm2 = vcmp.eq.s32.totalorder %v2224_v26, %v2483_v60  ;;  %vm4037_vm5 = vcmp.eq.s32.totalorder %v2224_v26, %v2487_v34  ;;  %v492_v38 = vadd.f32 %v491_v56, %v459_v3  ;;  %vm4039_vm8 = vcmp.eq.s32.totalorder %v2224_v26, %v2491_v53 }
  0x86   : > { %v487_v25 = vsel %vm4036_vm2, %v2933_v17, 0.0  ;;  %v488_v52 = vsel %vm4037_vm5, %v2936_v55, 0.0  ;;  %v489_v9 = vsel %vm4039_vm8, %v2952_v27, 0.0  ;;  %v501_v41 = vadd.f32 %v500_v31, %v460_v16 }
  0x87   : > { %v510_v61 = vadd.f32 %v509_v48, %v461_v58  ;;  %v519_v4 = vadd.f32 %v518_v51, %v462_v22  ;;  %vm4040_vm3 = vcmp.eq.s32.totalorder %v2224_v26, %v2495_v59  ;;  %v528_v5 = vadd.f32 %v527_v47, %v463_v10  ;;  %v4041_v22 = vld [vmem:[#allocation69_spill] sm:$0xff]  ;;  %v4042_v26 = vld [vmem:[#allocation23_spill] sm:$0xff]  ;;  %v4043_v10 = vld [vmem:[#allocation70_spill] sm:$0xff] }
  0x88   : > { %v490_v60 = vsel %vm4040_vm3, %v2967_v57, 0.0  ;;  %v537_v6 = vadd.f32 %v536_v46, %v464_v24  ;;  %v546_v34 = vadd.f32 %v545_v43, %v465_v44  ;;  %v555_v11 = vadd.f32 %v554_v54, %v466_v32  ;;  %v4044_v24 = vld [vmem:[#allocation25_spill] sm:$0xff] }
  0x89   : > { %v563_v3 = vadd.f32 %v2753_v1, %v2657_v20  ;;  %v572_v50 = vadd.f32 %v2759_v0, %v2663_v8  ;;  %v581_v16 = vadd.f32 %v2765_v39, %v2669_v7  ;;  %v493_v58 = vadd.f32 %v492_v38, %v475_v29  ;;  %v4045_v1 = vld [vmem:[#allocation71_spill] sm:$0xff]  ;;  %v4046_v20 = vld [vmem:[#allocation73_spill] sm:$0xff]  ;;  %v4047_v7 = vld [vmem:[#allocation72_spill] sm:$0xff] }
  0x8a   : > { %v590_v53 = vadd.f32 %v2773_v12, %v2677_v30  ;;  %v599_v59 = vadd.f32 %v4042_v26, %v4041_v22  ;;  %v608_v44 = vadd.f32 %v4044_v24, %v4043_v10  ;;  %v502_v32 = vadd.f32 %v501_v41, %v476_v49  ;;  %v4048_v39 = vld [vmem:[#allocation74_spill] sm:$0xff]  ;;  %v4049_v49 = vld [vmem:[#allocation19_spill] sm:$0xff]  ;;  %v4051_v38 = vld [vmem:[#allocation21_spill] sm:$0xff] }
  0x8b   : > { %v511_v56 = vadd.f32 %v510_v61, %v477_v18  ;;  %v520_v31 = vadd.f32 %v519_v4, %v478_v23  ;;  %v617_v48 = vadd.f32 %v4046_v20, %v4045_v1  ;;  %v529_v0 = vadd.f32 %v528_v5, %v479_v40  ;;  %v4050_v23 = vld [vmem:[#allocation20_spill] sm:$0xff] }
  0x8c   : > { %v538_v8 = vadd.f32 %v537_v6, %v480_v42  ;;  %v547_v51 = vadd.f32 %v546_v34, %v481_v35  ;;  %v626_v29 = vadd.f32 %v4048_v39, %v4047_v7  ;;  %v556_v47 = vadd.f32 %v555_v11, %v482_v45  ;;  %v4052_v61 = vld [vmem:[#allocation32_spill] sm:$0xff] }
  0x8d   : > { %v564_v30 = vadd.f32 %v563_v3, %v2837_v63  ;;  %v573_v12 = vadd.f32 %v572_v50, %v2843_v28  ;;  %v582_v46 = vadd.f32 %v581_v16, %v2849_v13  ;;  %v494_v43 = vrot.slane %v493_v58, 4 }
  0x8e   : > { %v591_v18 = vadd.f32 %v590_v53, %v4049_v49  ;;  %v600_v54 = vadd.f32 %v599_v59, %v4050_v23  ;;  %v609_v41 = vadd.f32 %v608_v44, %v4051_v38  ;;  %v503_v40 = vrot.slane %v502_v32, 4 }
  0x8f   : > { %v512_v42 = vrot.slane %v511_v56, 4  ;;  %v521_v35 = vrot.slane %v520_v31, 4  ;;  %v618_v4 = vadd.f32 %v617_v48, %v4052_v61  ;;  %v530_v5 = vrot.slane %v529_v0, 4 }
  0x90   : > { %v539_v45 = vrot.slane %v538_v8, 4  ;;  %v548_v6 = vrot.slane %v547_v51, 4  ;;  %v627_v63 = vadd.f32 %v626_v29, %v2879_v36  ;;  %v557_v28 = vrot.slane %v556_v47, 4 }
  0x91   : > { %v565_v34 = vadd.f32 %v564_v30, %v483_v15  ;;  %v574_v13 = vadd.f32 %v573_v12, %v484_v21  ;;  %v583_v11 = vadd.f32 %v582_v46, %v485_v2  ;;  %v495_v3 = vadd.f32 %v494_v43, %v493_v58 }
  0x92   : > { %v592_v50 = vadd.f32 %v591_v18, %v486_v33  ;;  %v601_v16 = vadd.f32 %v600_v54, %v487_v25  ;;  %v610_v53 = vadd.f32 %v609_v41, %v488_v52  ;;  %v504_v22 = vadd.f32 %v503_v40, %v502_v32 }
  0x93   : > { %v513_v26 = vadd.f32 %v512_v42, %v511_v56  ;;  %v522_v59 = vadd.f32 %v521_v35, %v520_v31  ;;  %v619_v10 = vadd.f32 %v618_v4, %v489_v9  ;;  %v531_v24 = vadd.f32 %v530_v5, %v529_v0 }
  0x94   : > { %v540_v44 = vadd.f32 %v539_v45, %v538_v8  ;;  %v549_v1 = vadd.f32 %v548_v6, %v547_v51  ;;  %v628_v20 = vadd.f32 %v627_v63, %v490_v60  ;;  %v558_v48 = vadd.f32 %v557_v28, %v556_v47 }
  0x95   : > { %v566_v7 = vrot.slane %v565_v34, 4  ;;  %v575_v39 = vrot.slane %v574_v13, 4  ;;  %v584_v36 = vrot.slane %v583_v11, 4  ;;  %v496_v29 = vrot.slane %v495_v3, 2 }
  0x96   : > { %v593_v15 = vrot.slane %v592_v50, 4  ;;  %v602_v21 = vrot.slane %v601_v16, 4  ;;  %v611_v2 = vrot.slane %v610_v53, 4  ;;  %v505_v58 = vrot.slane %v504_v22, 2 }
  0x97   : > { %v514_v33 = vrot.slane %v513_v26, 2  ;;  %v523_v25 = vrot.slane %v522_v59, 2  ;;  %v620_v52 = vrot.slane %v619_v10, 4  ;;  %v532_v32 = vrot.slane %v531_v24, 2 }
  0x98   : > { %v541_v56 = vrot.slane %v540_v44, 2  ;;  %v550_v31 = vrot.slane %v549_v1, 2  ;;  %v629_v9 = vrot.slane %v628_v20, 4  ;;  %v559_v0 = vrot.slane %v558_v48, 2 }
  0x99   : > { %v567_v8 = vadd.f32 %v566_v7, %v565_v34  ;;  %v576_v51 = vadd.f32 %v575_v39, %v574_v13  ;;  %v585_v60 = vadd.f32 %v584_v36, %v583_v11  ;;  %v497_v47 = vadd.f32 %v496_v29, %v495_v3 }
  0x9a   : > { %v594_v30 = vadd.f32 %v593_v15, %v592_v50  ;;  %v603_v12 = vadd.f32 %v602_v21, %v601_v16  ;;  %v612_v46 = vadd.f32 %v611_v2, %v610_v53  ;;  %v506_v43 = vadd.f32 %v505_v58, %v504_v22 }
  0x9b   : > { %v515_v49 = vadd.f32 %v514_v33, %v513_v26  ;;  %v524_v18 = vadd.f32 %v523_v25, %v522_v59  ;;  %v621_v23 = vadd.f32 %v620_v52, %v619_v10  ;;  %v533_v54 = vadd.f32 %v532_v32, %v531_v24 }
  0x9c   : > { %v542_v38 = vadd.f32 %v541_v56, %v540_v44  ;;  %v551_v41 = vadd.f32 %v550_v31, %v549_v1  ;;  %v630_v40 = vadd.f32 %v629_v9, %v628_v20  ;;  %v560_v42 = vadd.f32 %v559_v0, %v558_v48  ;;  %v4061_v9 = vld [vmem:[#allocation57_spill] sm:$0xff] }
  0x9d   : > { %v568_v35 = vrot.slane %v567_v8, 2  ;;  %v577_v61 = vrot.slane %v576_v51, 2  ;;  %v586_v4 = vrot.slane %v585_v60, 2  ;;  %v498_v5 = vrot.slane %v497_v47, 1 }
  0x9e   : > { %v595_v45 = vrot.slane %v594_v30, 2  ;;  %v604_v6 = vrot.slane %v603_v12, 2  ;;  %v613_v63 = vrot.slane %v612_v46, 2  ;;  %v507_v28 = vrot.slane %v506_v43, 1 }
  0x9f   : > { %v516_v34 = vrot.slane %v515_v49, 1  ;;  %v525_v13 = vrot.slane %v524_v18, 1  ;;  %v622_v11 = vrot.slane %v621_v23, 2  ;;  %v534_v3 = vrot.slane %v533_v54, 1 }
  0xa0   : > { %v543_v50 = vrot.slane %v542_v38, 1  ;;  %v552_v16 = vrot.slane %v551_v41, 1  ;;  %v631_v53 = vrot.slane %v630_v40, 2  ;;  %v561_v22 = vrot.slane %v560_v42, 1 }
  0xa1   : > { %v569_v26 = vadd.f32 %v568_v35, %v567_v8  ;;  %v578_v59 = vadd.f32 %v577_v61, %v576_v51  ;;  %v587_v10 = vadd.f32 %v586_v4, %v585_v60  ;;  %v3001_v24 = vadd.f32 %v498_v5, %v497_v47  ;;  %v4062_v51 = vld [vmem:[#allocation58_spill] sm:$0xff]  ;;  %v4063_v47 = vld [vmem:[#allocation59_spill] sm:$0xff]  ;;  %v4071_v61 = vld [vmem:[#allocation64_spill] sm:$0xff] }
  0xa2   : > { %v596_v44 = vadd.f32 %v595_v45, %v594_v30  ;;  %v605_v1 = vadd.f32 %v604_v6, %v603_v12  ;;  %v614_v20 = vadd.f32 %v613_v63, %v612_v46  ;;  %v3003_v48 = vadd.f32 %v507_v28, %v506_v43  ;;  %v4064_v12 = vld [vmem:[#allocation60_spill] sm:$0xff] }
  0xa3   : > { %4053 = vst [vmem:[#allocation45_spill] sm:$0xff] %v3001_v24  ;;  %v3005_v7 = vadd.f32 %v516_v34, %v515_v49  ;;  %v3007_v39 = vadd.f32 %v525_v13, %v524_v18  ;;  %v623_v36 = vadd.f32 %v622_v11, %v621_v23  ;;  %v3009_v29 = vadd.f32 %v534_v3, %v533_v54  ;;  %v4065_v49 = vld [vmem:[#allocation61_spill] sm:$0xff]  ;;  %v4066_v23 = vld [vmem:[#allocation62_spill] sm:$0xff]  ;;  %v4074_v6 = vld [vmem:[#allocation68_spill] sm:$0xff] }
  0xa4   : > { %4054 = vst [vmem:[#allocation52_spill] sm:$0xff] %v3003_v48  ;;  %v3011_v15 = vadd.f32 %v543_v50, %v542_v38  ;;  %v3013_v21 = vadd.f32 %v552_v16, %v551_v41  ;;  %v632_v2 = vadd.f32 %v631_v53, %v630_v40  ;;  %v3015_v58 = vadd.f32 %v561_v22, %v560_v42  ;;  %v4067_v38 = vld [vmem:[#allocation63_spill] sm:$0xff] }
  0xa5   : > { %4055 = vst [vmem:[#allocation39_spill] sm:$0xff] %v3005_v7  ;;  %4056 = vst [vmem:[#allocation40_spill] sm:$0xff] %v3007_v39  ;;  %v570_v33 = vrot.slane %v569_v26, 1  ;;  %v579_v25 = vrot.slane %v578_v59, 1  ;;  %v588_v52 = vrot.slane %v587_v10, 1  ;;  %v597_v32 = vrot.slane %v596_v44, 1 }
  0xa6   : > { %4057 = vst [vmem:[#allocation41_spill] sm:$0xff] %v3009_v29  ;;  %4058 = vst [vmem:[#allocation49_spill] sm:$0xff] %v3011_v15  ;;  %v606_v56 = vrot.slane %v605_v1, 1  ;;  %v615_v31 = vrot.slane %v614_v20, 1  ;;  %v709_v0 = vmin.f32 %v4061_v9, %v2914_v19  ;;  %v624_v8 = vrot.slane %v623_v36, 1  ;;  %v4114_v15 = vld [vmem:[#allocation31_spill] sm:$0xff] }
  0xa7   : > { %4059 = vst [vmem:[#allocation50_spill] sm:$0xff] %v3013_v21  ;;  %4060 = vst [vmem:[#allocation51_spill] sm:$0xff] %v3015_v58  ;;  %v718_v60 = vmin.f32 %v4062_v51, %v2917_v62  ;;  %v727_v30 = vmin.f32 %v4063_v47, %v2920_v14  ;;  %v736_v46 = vmin.f32 %v4064_v12, %v2930_v37  ;;  %v633_v43 = vrot.slane %v632_v2, 1  ;;  %v4086_v51 = vld [vmem:[#allocation65_spill] sm:$0xff]  ;;  %v4113_v21 = vld [vmem:[#allocation30_spill] sm:$0xff] }
  0xa8   : > { %v745_v18 = vmin.f32 %v4065_v49, %v2933_v17  ;;  %v754_v54 = vmin.f32 %v4066_v23, %v2936_v55  ;;  %v763_v41 = vmin.f32 %v4067_v38, %v2952_v27  ;;  %v3031_v40 = vadd.f32 %v570_v33, %v569_v26  ;;  %v4087_v23 = vld [vmem:[#allocation66_spill] sm:$0xff]  ;;  %v4116_v7 = vld [vmem:[#allocation44_spill] sm:$0xff] }
  0xa9   : > { %v3033_v42 = vadd.f32 %v579_v25, %v578_v59  ;;  %v3035_v35 = vadd.f32 %v588_v52, %v587_v10  ;;  %v772_v4 = vmin.f32 %v4071_v61, %v2967_v57  ;;  %v3039_v5 = vadd.f32 %v597_v32, %v596_v44  ;;  %v4078_v59 = vld [vmem:[#allocation53_spill] sm:$0xff]  ;;  %v4082_v52 = vld [vmem:[#allocation55_spill] sm:$0xff]  ;;  %v4119_v29 = vld [vmem:[#allocation48_spill] sm:$0xff] }
  0xaa   : > { %4068 = vst [vmem:[#allocation69_spill] sm:$0xff] %v3031_v40  ;;  %v3041_v45 = vadd.f32 %v606_v56, %v605_v1  ;;  %v701_v63 = vrot.slane %v4074_v6, 4  ;;  %v710_v28 = vrot.slane %v709_v0, 4  ;;  %v3044_v34 = vadd.f32 %v615_v31, %v614_v20  ;;  %v4080_v1 = vld [vmem:[#allocation54_spill] sm:$0xff]  ;;  %v4118_v57 = vld [vmem:[#allocation47_spill] sm:$0xff] }
  0xab   : > { %4069 = vst [vmem:[#allocation23_spill] sm:$0xff] %v3033_v42  ;;  %4070 = vst [vmem:[#allocation70_spill] sm:$0xff] %v3035_v35  ;;  %v719_v13 = vrot.slane %v718_v60, 4  ;;  %v728_v11 = vrot.slane %v727_v30, 4  ;;  %v737_v3 = vrot.slane %v736_v46, 4  ;;  %v3046_v50 = vadd.f32 %v624_v8, %v623_v36  ;;  %v4084_v36 = vld [vmem:[#allocation56_spill] sm:$0xff] }
  0xac   : > { %4072 = vst [vmem:[#allocation25_spill] sm:$0xff] %v3039_v5  ;;  %4073 = vst [vmem:[#allocation71_spill] sm:$0xff] %v3041_v45  ;;  %v746_v16 = vrot.slane %v745_v18, 4  ;;  %v755_v53 = vrot.slane %v754_v54, 4  ;;  %v764_v22 = vrot.slane %v763_v41, 4  ;;  %v3048_v26 = vadd.f32 %v633_v43, %v632_v2 }
  0xad   : > { %4075 = vst [vmem:[#allocation73_spill] sm:$0xff] %v3044_v34  ;;  %4076 = vst [vmem:[#allocation72_spill] sm:$0xff] %v3046_v50  ;;  %v4079_v10 = vrot.slane %v4078_v59, 4  ;;  %v4081_v33 = vrot.slane %v4080_v1, 4  ;;  %v773_v20 = vrot.slane %v772_v4, 4  ;;  %v4083_v32 = vrot.slane %v4082_v52, 4 }
  0xae   : > { %4077 = vst [vmem:[#allocation74_spill] sm:$0xff] %v3048_v26  ;;  %v4085_v31 = vrot.slane %v4084_v36, 4  ;;  %v702_v2 = vmin.f32 %v4074_v6, %v701_v63  ;;  %v711_v8 = vmin.f32 %v709_v0, %v710_v28  ;;  %v640_v47 = vrot.slane %v4086_v51, 2 }
  0xaf   : > { %v666_v44 = vmin.f32 %v4078_v59, %v4079_v10  ;;  %v675_v25 = vmin.f32 %v4080_v1, %v4081_v33  ;;  %v684_v56 = vmin.f32 %v4082_v52, %v4083_v32  ;;  %v720_v12 = vmin.f32 %v718_v60, %v719_v13  ;;  %v4088_v1 = vld [vmem:[#allocation67_spill] sm:$0xff] }
  0xb0   : > { %v693_v9 = vmin.f32 %v4084_v36, %v4085_v31  ;;  %v729_v43 = vmin.f32 %v727_v30, %v728_v11  ;;  %v738_v49 = vmin.f32 %v736_v46, %v737_v3  ;;  %v649_v38 = vrot.slane %v4087_v23, 2 }
  0xb1   : > { %v747_v61 = vmin.f32 %v745_v18, %v746_v16  ;;  %v756_v59 = vmin.f32 %v754_v54, %v755_v53  ;;  %v765_v10 = vmin.f32 %v763_v41, %v764_v22  ;;  %v658_v33 = vrot.slane %v4088_v1, 2 }
  0xb2   : > { %v667_v52 = vrot.slane %v666_v44, 2  ;;  %v676_v32 = vrot.slane %v675_v25, 2  ;;  %v774_v26 = vmin.f32 %v772_v4, %v773_v20  ;;  %v685_v50 = vrot.slane %v684_v56, 2 }
  0xb3   : > { %v694_v36 = vrot.slane %v693_v9, 2  ;;  %v703_v31 = vrot.slane %v702_v2, 2  ;;  %v712_v6 = vrot.slane %v711_v8, 2  ;;  %v641_v0 = vmin.f32 %v4086_v51, %v640_v47 }
  0xb4   : > { %v721_v63 = vrot.slane %v720_v12, 2  ;;  %v730_v60 = vrot.slane %v729_v43, 2  ;;  %v739_v30 = vrot.slane %v738_v49, 2  ;;  %v650_v46 = vmin.f32 %v4087_v23, %v649_v38 }
  0xb5   : > { %v748_v28 = vrot.slane %v747_v61, 2  ;;  %v757_v18 = vrot.slane %v756_v59, 2  ;;  %v766_v54 = vrot.slane %v765_v10, 2  ;;  %v659_v41 = vmin.f32 %v4088_v1, %v658_v33 }
  0xb6   : > { %v668_v13 = vmin.f32 %v666_v44, %v667_v52  ;;  %v677_v11 = vmin.f32 %v675_v25, %v676_v32  ;;  %v775_v3 = vrot.slane %v774_v26, 2  ;;  %v686_v4 = vmin.f32 %v684_v56, %v685_v50 }
  0xb7   : > { %v695_v16 = vmin.f32 %v693_v9, %v694_v36  ;;  %v704_v53 = vmin.f32 %v702_v2, %v703_v31  ;;  %v713_v22 = vmin.f32 %v711_v8, %v712_v6  ;;  %v642_v20 = vrot.slane %v641_v0, 1 }
  0xb8   : > { %v722_v34 = vmin.f32 %v720_v12, %v721_v63  ;;  %v731_v51 = vmin.f32 %v729_v43, %v730_v60  ;;  %v740_v47 = vmin.f32 %v738_v49, %v739_v30  ;;  %v651_v45 = vrot.slane %v650_v46, 1  ;;  %v4092_v63 = vld [vmem:[#allocation12_spill] sm:$0xff] }
  0xb9   : > { %v749_v5 = vmin.f32 %v747_v61, %v748_v28  ;;  %v758_v35 = vmin.f32 %v756_v59, %v757_v18  ;;  %v767_v23 = vmin.f32 %v765_v10, %v766_v54  ;;  %v660_v38 = vrot.slane %v659_v41, 1 }
  0xba   : > { %v669_v42 = vrot.slane %v668_v13, 1  ;;  %v678_v40 = vrot.slane %v677_v11, 1  ;;  %v776_v58 = vmin.f32 %v774_v26, %v775_v3  ;;  %v687_v1 = vrot.slane %v686_v4, 1  ;;  %v4101_v3 = vld [vmem:[#allocation17_spill] sm:$0xff] }
  0xbb   : > { %v696_v44 = vrot.slane %v695_v16, 1  ;;  %v705_v25 = vrot.slane %v704_v53, 1  ;;  %v714_v33 = vrot.slane %v713_v22, 1  ;;  %v3069_v50 = vmin.f32 %v641_v0, %v642_v20 }
  0xbc   : > { %v723_v56 = vrot.slane %v722_v34, 1  ;;  %v732_v9 = vrot.slane %v731_v51, 1  ;;  %v741_v2 = vrot.slane %v740_v47, 1  ;;  %v3071_v8 = vmin.f32 %v650_v46, %v651_v45  ;;  %v4096_v46 = vld [vmem:[#allocation13_spill] sm:$0xff] }
  0xbd   : > { %v750_v12 = vrot.slane %v749_v5, 1  ;;  %v759_v43 = vrot.slane %v758_v35, 1  ;;  %v768_v49 = vrot.slane %v767_v23, 1  ;;  %v3073_v61 = vmin.f32 %v659_v41, %v660_v38  ;;  %v4099_v41 = vld [vmem:[#allocation15_spill] sm:$0xff] }
  0xbe   : > { %v3075_v59 = vmin.f32 %v668_v13, %v669_v42  ;;  %v3077_v10 = vmin.f32 %v677_v11, %v678_v40  ;;  %v777_v26 = vrot.slane %v776_v58, 1  ;;  %v3079_v52 = vmin.f32 %v686_v4, %v687_v1  ;;  %v4100_v11 = vld [vmem:[#allocation16_spill] sm:$0xff]  ;;  %v4102_v4 = vld [vmem:[#allocation22_spill] sm:$0xff]  ;;  %v4107_v1 = vld [vmem:[#allocation35_spill] sm:$0xff] }
  0xbf   : > { %v3081_v32 = vmin.f32 %v695_v16, %v696_v44  ;;  %v3083_v36 = vmin.f32 %v704_v53, %v705_v25  ;;  %v3085_v31 = vmin.f32 %v713_v22, %v714_v33  ;;  %v3087_v45 = vmin.f32 %v722_v34, %v723_v56  ;;  %v4098_v34 = vld [vmem:[#allocation14_spill] sm:$0xff]  ;;  %v4103_v53 = vld [vmem:[#allocation24_spill] sm:$0xff] }
  0xc0   : > { %v3089_v6 = vmin.f32 %v731_v51, %v732_v9  ;;  %v3091_v0 = vmin.f32 %v740_v47, %v741_v2  ;;  %v779_v42 = vsub.f32 %v3069_v50, %v4092_v63  ;;  %v3095_v40 = vmin.f32 %v749_v5, %v750_v12  ;;  %v4104_v22 = vld [vmem:[#allocation26_spill] sm:$0xff]  ;;  %v4105_v51 = vld [vmem:[#allocation27_spill] sm:$0xff]  ;;  %v4108_v33 = vld [vmem:[#allocation36_spill] sm:$0xff] }
  0xc1   : > { %4089 = vst [vmem:[#allocation19_spill] sm:$0xff] %v3087_v45  ;;  %v3097_v60 = vmin.f32 %v758_v35, %v759_v43  ;;  %v3099_v30 = vmin.f32 %v767_v23, %v768_v49  ;;  %v780_v28 = vsub.f32 %v3071_v8, %v4096_v46  ;;  %v3103_v18 = vmin.f32 %v776_v58, %v777_v26  ;;  %v4106_v23 = vld [vmem:[#allocation28_spill] sm:$0xff]  ;;  %v4109_v9 = vld [vmem:[#allocation37_spill] sm:$0xff]  ;;  %v4110_v12 = vld [vmem:[#allocation38_spill] sm:$0xff] }
  0xc2   : > { %4090 = vst [vmem:[#allocation20_spill] sm:$0xff] %v3089_v6  ;;  %4091 = vst [vmem:[#allocation21_spill] sm:$0xff] %v3091_v0  ;;  %v781_v54 = vsub.f32 %v3073_v61, %v4098_v34  ;;  %v782_v13 = vsub.f32 %v3075_v59, %v4099_v41  ;;  %v783_v5 = vsub.f32 %v3077_v10, %v4100_v11  ;;  %v843_v25 = vmul.f32 0.5, %v779_v42  ;;  %v4111_v26 = vld [vmem:[#allocation42_spill] sm:$0xff]  ;;  %v3134_v46 = vld [vmem:[%s2135_s20 + $0x80] sm:$0xff] }
  0xc3   : > { %4093 = vst [vmem:[#allocation32_spill] sm:$0xff] %v3095_v40  ;;  %4094 = vst [vmem:[#allocation57_spill] sm:$0xff] %v3097_v60  ;;  %v784_v35 = vsub.f32 %v3079_v52, %v4101_v3  ;;  %v785_v16 = vsub.f32 %v3081_v32, %v4102_v4  ;;  %v786_v58 = vsub.f32 %v3083_v36, %v4103_v53  ;;  %v844_v49 = vmul.f32 0.5, %v780_v28  ;;  %v3139_v34 = vld [vmem:[%s2135_s20 + $0x88] sm:$0xff]  ;;  %v3144_v3 = vld [vmem:[%s2135_s20 + $0x90] sm:$0xff] }
  0xc4   : > { %4095 = vst [vmem:[#allocation58_spill] sm:$0xff] %v3099_v30  ;;  %4097 = vst [vmem:[#allocation59_spill] sm:$0xff] %v3103_v18  ;;  %v787_v20 = vsub.f32 %v3085_v31, %v4104_v22  ;;  %v788_v47 = vsub.f32 %v3087_v45, %v4105_v51  ;;  %v789_v38 = vsub.f32 %v3089_v6, %v4106_v23  ;;  %v845_v11 = vmul.f32 0.5, %v781_v54  ;;  %v3149_v4 = vld [vmem:[%s2135_s20 + $0x98] sm:$0xff]  ;;  %v3154_v22 = vld [vmem:[%s2135_s20 + $0xa0] sm:$0xff] }
  0xc5   : > { %v790_v44 = vsub.f32 %v3091_v0, %v4107_v1  ;;  %v791_v56 = vsub.f32 %v3095_v40, %v4108_v33  ;;  %v792_v2 = vsub.f32 %v3097_v60, %v4109_v9  ;;  %v846_v23 = vmul.f32 0.5, %v782_v13  ;;  %v3159_v1 = vld [vmem:[%s2135_s20 + $0xa8] sm:$0xff]  ;;  %v3164_v33 = vld [vmem:[%s2135_s20 + $0xb0] sm:$0xff]  ;;  %v3169_v42 = vld [vmem:[%s2135_s20 + $0xb8] sm:$0xff] }
  0xc6   : > { %v847_v28 = vmul.f32 0.5, %v783_v5  ;;  %v907_v41 = vmul.f32 1.442695, %v843_v25  ;;  %v4112_v63 = vld [vmem:[#allocation29_spill] sm:$0xff]  ;;  %v848_v51 = vmul.f32 0.5, %v784_v35  ;;  %v849_v39 = vmul.f32 0.5, %v785_v16 }
  0xc7   : > { %v909_v43 = vmul.f32 1.442695, %v844_v49  ;;  %v911_v9 = vmul.f32 1.442695, %v845_v11  ;;  %v4115_v5 = vld [vmem:[#allocation43_spill] sm:$0xff]  ;;  %v850_v48 = vmul.f32 0.5, %v786_v58 }
  0xc8   : > { %v913_v24 = vmul.f32 1.442695, %v846_v23  ;;  %v4117_v13 = vld [vmem:[#allocation46_spill] sm:$0xff]  ;;  %v851_v49 = vmul.f32 0.5, %v787_v20  ;;  %1669 = vpow2.f32 %v907_v41  ;;  %v915_v54 = vmul.f32 1.442695, %v847_v28 }
  0xc9   : > { %v852_v11 = vmul.f32 0.5, %v788_v47  ;;  %1671 = vpow2.f32 %v909_v43  ;;  %v917_v25 = vmul.f32 1.442695, %v848_v51  ;;  %v853_v53 = vmul.f32 0.5, %v789_v38  ;;  %v3190_v23 = vld [vmem:[%s2135_s20 + $0x100] sm:$0xff]  ;;  %v3195_v47 = vld [vmem:[%s2135_s20 + $0x108] sm:$0xff] }
  0xca   : > { %1673 = vpow2.f32 %v911_v9  ;;  %v919_v58 = vmul.f32 1.442695, %v849_v39  ;;  %v854_v41 = vmul.f32 0.5, %v790_v44  ;;  %v921_v28 = vmul.f32 1.442695, %v850_v48  ;;  %v3200_v39 = vld [vmem:[%s2135_s20 + $0x110] sm:$0xff] }
  0xcb   : > { %1675 = vpow2.f32 %v913_v24  ;;  %v855_v51 = vmul.f32 0.5, %v791_v56  ;;  %v923_v38 = vmul.f32 1.442695, %v851_v49  ;;  %v856_v27 = vmul.f32 0.5, %v792_v2  ;;  %v3205_v24 = vld [vmem:[%s2135_s20 + $0x118] sm:$0xff]  ;;  %v3213_v43 = vld [vmem:[%s2135_s20 + $0x120] sm:$0xff] }
  0xcc   : > { %1677 = vpow2.f32 %v915_v54  ;;  %v925_v44 = vmul.f32 1.442695, %v852_v11  ;;  %v4120_v56 = vsub.f32 %v3099_v30, %v4110_v12  ;;  %v927_v49 = vmul.f32 1.442695, %v853_v53  ;;  %v3221_v48 = vld [vmem:[%s2135_s20 + $0x128] sm:$0xff]  ;;  %v3229_v2 = vld [vmem:[%s2135_s20 + $0x130] sm:$0xff] }
  0xcd   : > { %1679 = vpow2.f32 %v917_v25  ;;  %v4121_v25 = vsub.f32 %v3103_v18, %v4111_v26  ;;  %v929_v9 = vmul.f32 1.442695, %v854_v41  ;;  %v4122_v53 = vsub.f32 %v3069_v50, %v3134_v46  ;;  %v3237_v20 = vld [vmem:[%s2135_s20 + $0x138] sm:$0xff]  ;;  %v3245_v12 = vld [vmem:[%s2135_s20 + $0x140] sm:$0xff]  ;;  %v3253_v26 = vld [vmem:[%s2135_s20 + $0x148] sm:$0xff] }
  0xce   : > { %v857_v54 = vmul.f32 0.5, %v4120_v56  ;;  %1681 = vpow2.f32 %v919_v58  ;;  %v931_v56 = vmul.f32 1.442695, %v855_v51  ;;  %v4123_v41 = vsub.f32 %v3071_v8, %v3139_v34  ;;  %v3263_v46 = vld [vmem:[%s2135_s20 + $0x150] sm:$0xff] }
  0xcf   : > { %v858_v11 = vmul.f32 0.5, %v4121_v25  ;;  %1683 = vpow2.f32 %v921_v28  ;;  %v859_v58 = vmul.f32 0.5, %v4122_v53  ;;  %v933_v25 = vmul.f32 1.442695, %v856_v27 }
  0xd0   : > { %1685 = vpow2.f32 %v923_v38  ;;  %v860_v28 = vmul.f32 0.5, %v4123_v41  ;;  %v4124_v51 = vsub.f32 %v3073_v61, %v3144_v3  ;;  %v935_v53 = vmul.f32 1.442695, %v857_v54 }
  0xd1   : > { %1687 = vpow2.f32 %v925_v44  ;;  %v4125_v27 = vsub.f32 %v3075_v59, %v3149_v4  ;;  %v937_v41 = vmul.f32 1.442695, %v858_v11  ;;  %v4126_v54 = vsub.f32 %v3077_v10, %v3154_v22  ;;  %v3273_v22 = vld [vmem:[%s2135_s20 + $0x158] sm:$0xff] }
  0xd2   : > { %v861_v38 = vmul.f32 0.5, %v4124_v51  ;;  %1689 = vpow2.f32 %v927_v49  ;;  %v939_v51 = vmul.f32 1.442695, %v859_v58 }
  0xd3   : > { %v862_v44 = vmul.f32 0.5, %v4125_v27  ;;  %1691 = vpow2.f32 %v929_v9  ;;  %v863_v49 = vmul.f32 0.5, %v4126_v54  ;;  %v4127_v9 = vsub.f32 %v3079_v52, %v3159_v1  ;;  %v3283_v1 = vld [vmem:[%s2135_s20 + $0x160] sm:$0xff] }
  0xd4   : > { %1693 = vpow2.f32 %v931_v56  ;;  %v941_v27 = vmul.f32 1.442695, %v860_v28  ;;  %v4129_v56 = vsub.f32 %v3081_v32, %v3164_v33  ;;  %v943_v4 = vmul.f32 1.442695, %v861_v38  ;;  %v3293_v33 = vld [vmem:[%s2135_s20 + $0x168] sm:$0xff] }
  0xd5   : > { %v3260_v34 = vpop.eup %1669  ;;  %v864_v11 = vmul.f32 0.5, %v4127_v9  ;;  %1695 = vpow2.f32 %v933_v25  ;;  %v4131_v25 = vsub.f32 %v3083_v36, %v3169_v42  ;;  %v945_v58 = vmul.f32 1.442695, %v862_v44  ;;  %v3303_v42 = vld [vmem:[%s2135_s20 + $0x170] sm:$0xff] }
  0xd6   : > { %v3270_v3 = vpop.eup %1671  ;;  %v865_v54 = vmul.f32 0.5, %v4129_v56  ;;  %1697 = vpow2.f32 %v935_v53  ;;  %v4133_v53 = vsub.f32 %v3085_v31, %v4112_v63  ;;  %v947_v28 = vmul.f32 1.442695, %v863_v49  ;;  %v3313_v63 = vld [vmem:[%s2135_s20 + $0x178] sm:$0xff] }
  0xd7   : > { %4128 = vst [vmem:[#allocation60_spill] sm:$0xff] %v3270_v3  ;;  %v3280_v16 = vpop.eup %1673  ;;  %v866_v9 = vmul.f32 0.5, %v4131_v25  ;;  %1699 = vpow2.f32 %v937_v41  ;;  %v4135_v41 = vsub.f32 %v3087_v45, %v4113_v21  ;;  %v949_v38 = vmul.f32 1.442695, %v864_v11  ;;  %v3323_v21 = vld [vmem:[%s2135_s20 + $0x180] sm:$0xff]  ;;  %v3393_v3 = vld [vmem:[%s2135_s20 + $0x1b8] sm:$0xff] }
  0xd8   : > { %4130 = vst [vmem:[#allocation61_spill] sm:$0xff] %v3280_v16  ;;  %v3290_v35 = vpop.eup %1675  ;;  %v867_v56 = vmul.f32 0.5, %v4133_v53  ;;  %1701 = vpow2.f32 %v939_v51  ;;  %v4137_v51 = vsub.f32 %v3089_v6, %v4114_v15  ;;  %v951_v44 = vmul.f32 1.442695, %v865_v54  ;;  %v3333_v15 = vld [vmem:[%s2135_s20 + $0x188] sm:$0xff] }
  0xd9   : > { %4132 = vst [vmem:[#allocation62_spill] sm:$0xff] %v3290_v35  ;;  %v3300_v16 = vpop.eup %1677  ;;  %v868_v25 = vmul.f32 0.5, %v4135_v41  ;;  %1703 = vpow2.f32 %v941_v27  ;;  %v4139_v27 = vsub.f32 %v3091_v0, %v4115_v5  ;;  %v953_v49 = vmul.f32 1.442695, %v866_v9  ;;  %v3343_v5 = vld [vmem:[%s2135_s20 + $0x190] sm:$0xff] }
  0xda   : > { %4134 = vst [vmem:[#allocation63_spill] sm:$0xff] %v3300_v16  ;;  %v3310_v35 = vpop.eup %1679  ;;  %v869_v53 = vmul.f32 0.5, %v4137_v51  ;;  %1705 = vpow2.f32 %v943_v4  ;;  %v4141_v54 = vsub.f32 %v3095_v40, %v4116_v7  ;;  %v955_v11 = vmul.f32 1.442695, %v867_v56  ;;  %v3353_v7 = vld [vmem:[%s2135_s20 + $0x198] sm:$0xff] }
  0xdb   : > { %4136 = vst [vmem:[#allocation64_spill] sm:$0xff] %v3310_v35  ;;  %v3320_v16 = vpop.eup %1681  ;;  %v870_v41 = vmul.f32 0.5, %v4139_v27  ;;  %1707 = vpow2.f32 %v945_v58  ;;  %v4143_v9 = vsub.f32 %v3097_v60, %v4117_v13  ;;  %v957_v4 = vmul.f32 1.442695, %v868_v25  ;;  %v3363_v13 = vld [vmem:[%s2135_s20 + $0x1a0] sm:$0xff] }
  0xdc   : > { %4138 = vst [vmem:[#allocation68_spill] sm:$0xff] %v3320_v16  ;;  %v3330_v35 = vpop.eup %1683  ;;  %v871_v51 = vmul.f32 0.5, %v4141_v54  ;;  %1709 = vpow2.f32 %v947_v28  ;;  %v4145_v56 = vsub.f32 %v3099_v30, %v4118_v57  ;;  %v959_v58 = vmul.f32 1.442695, %v869_v53  ;;  %v3373_v57 = vld [vmem:[%s2135_s20 + $0x1a8] sm:$0xff] }
  0xdd   : > { %4140 = vst [vmem:[#allocation53_spill] sm:$0xff] %v3330_v35  ;;  %v3340_v16 = vpop.eup %1685  ;;  %v872_v27 = vmul.f32 0.5, %v4143_v9  ;;  %1711 = vpow2.f32 %v949_v38  ;;  %v4147_v25 = vsub.f32 %v3103_v18, %v4119_v29  ;;  %v961_v28 = vmul.f32 1.442695, %v870_v41  ;;  %v3383_v29 = vld [vmem:[%s2135_s20 + $0x1b0] sm:$0xff] }
  0xde   : > { %4142 = vst [vmem:[#allocation54_spill] sm:$0xff] %v3340_v16  ;;  %v3350_v35 = vpop.eup %1687  ;;  %v873_v54 = vmul.f32 0.5, %v4145_v56  ;;  %1713 = vpow2.f32 %v951_v44  ;;  %v4149_v53 = vsub.f32 %v3069_v50, %v3190_v23  ;;  %v963_v38 = vmul.f32 1.442695, %v871_v51 }
  0xdf   : > { %4144 = vst [vmem:[#allocation55_spill] sm:$0xff] %v3350_v35  ;;  %v3360_v16 = vpop.eup %1689  ;;  %v874_v9 = vmul.f32 0.5, %v4147_v25  ;;  %1715 = vpow2.f32 %v953_v49  ;;  %v4151_v41 = vsub.f32 %v3071_v8, %v3195_v47  ;;  %v839_v47 = vsub.f32 %v3095_v40, %v2933_v17  ;;  %v4162_v17 = vld [vmem:[#allocation33_spill] sm:$0xff] }
  0xe0   : > { %4146 = vst [vmem:[#allocation56_spill] sm:$0xff] %v3360_v16  ;;  %v3370_v35 = vpop.eup %1691  ;;  %v875_v56 = vmul.f32 0.5, %v4149_v53  ;;  %1717 = vpow2.f32 %v955_v11  ;;  %v4153_v11 = vsub.f32 %v3073_v61, %v3200_v39  ;;  %v967_v53 = vmul.f32 1.442695, %v873_v54 }
  0xe1   : > { %4148 = vst [vmem:[#allocation65_spill] sm:$0xff] %v3370_v35  ;;  %v3380_v16 = vpop.eup %1693  ;;  %v876_v25 = vmul.f32 0.5, %v4151_v41  ;;  %1719 = vpow2.f32 %v957_v4  ;;  %v965_v35 = vmul.f32 1.442695, %v872_v27  ;;  %v4155_v4 = vsub.f32 %v3075_v59, %v3205_v24 }
  0xe2   : > { %4150 = vst [vmem:[#allocation66_spill] sm:$0xff] %v3380_v16  ;;  %v3390_v44 = vpop.eup %1695  ;;  %v877_v51 = vmul.f32 0.5, %v4153_v11  ;;  %1721 = vpow2.f32 %v959_v58  ;;  %v969_v41 = vmul.f32 1.442695, %v874_v9  ;;  %v4157_v39 = vsub.f32 %v3077_v10, %v3213_v43 }
  0xe3   : > { %4152 = vst [vmem:[#allocation67_spill] sm:$0xff] %v3390_v44  ;;  %v3400_v49 = vpop.eup %1697  ;;  %v878_v27 = vmul.f32 0.5, %v4155_v4  ;;  %1723 = vpow2.f32 %v961_v28  ;;  %v971_v54 = vmul.f32 1.442695, %v875_v56  ;;  %v4158_v24 = vsub.f32 %v3079_v52, %v3221_v48 }
  0xe4   : > { %4154 = vst [vmem:[#allocation12_spill] sm:$0xff] %v3400_v49  ;;  %v3407_v44 = vpop.eup %1699  ;;  %v879_v58 = vmul.f32 0.5, %v4157_v39  ;;  %1725 = vpow2.f32 %v963_v38  ;;  %v973_v9 = vmul.f32 1.442695, %v876_v25  ;;  %v4159_v43 = vsub.f32 %v3081_v32, %v3229_v2 }
  0xe5   : > { %4156 = vst [vmem:[#allocation13_spill] sm:$0xff] %v3407_v44  ;;  %v3414_v11 = vpop.eup %1701  ;;  %v880_v28 = vmul.f32 0.5, %v4158_v24  ;;  %1727 = vpow2.f32 %v965_v35  ;;  %v975_v56 = vmul.f32 1.442695, %v877_v51  ;;  %v4160_v35 = vsub.f32 %v3083_v36, %v3237_v20 }
  0xe6   : > { %v3421_v4 = vpop.eup %1703  ;;  %v881_v38 = vmul.f32 0.5, %v4159_v43  ;;  %1729 = vpow2.f32 %v967_v53  ;;  %v977_v25 = vmul.f32 1.442695, %v878_v27  ;;  %v840_v23 = vsub.f32 %v3097_v60, %v2936_v55  ;;  %v4164_v55 = vld [vmem:[#allocation34_spill] sm:$0xff] }
  0xe7   : > { %v3428_v39 = vpop.eup %1705  ;;  %v882_v48 = vmul.f32 0.5, %v4160_v35  ;;  %1731 = vpow2.f32 %v969_v41  ;;  %v4161_v2 = vsub.f32 %v3085_v31, %v3245_v12  ;;  %v979_v53 = vmul.f32 1.442695, %v879_v58 }
  0xe8   : > { %v3435_v24 = vpop.eup %1707  ;;  %1733 = vpow2.f32 %v971_v54  ;;  %v841_v44 = vsub.f32 %v3099_v30, %v4162_v17  ;;  %v4163_v20 = vsub.f32 %v3087_v45, %v3253_v26  ;;  %v981_v41 = vmul.f32 1.442695, %v880_v28 }
  0xe9   : > { %v883_v51 = vmul.f32 0.5, %v4161_v2  ;;  %v3442_v43 = vpop.eup %1709  ;;  %1735 = vpow2.f32 %v973_v9  ;;  %v842_v49 = vsub.f32 %v3103_v18, %v4164_v55  ;;  %v4165_v12 = vsub.f32 %v3089_v6, %v3263_v46 }
  0xea   : > { %v884_v27 = vmul.f32 0.5, %v4163_v20  ;;  %v3449_v35 = vpop.eup %1711  ;;  %1737 = vpow2.f32 %v975_v56  ;;  %v983_v54 = vmul.f32 1.442695, %v881_v38  ;;  %v4166_v17 = vsub.f32 %v3091_v0, %v3273_v22 }
  0xeb   : > { %v885_v58 = vmul.f32 0.5, %v4165_v12  ;;  %v3456_v2 = vpop.eup %1713  ;;  %v4167_v28 = vsub.f32 %v3095_v40, %v3283_v1  ;;  %1739 = vpow2.f32 %v977_v25  ;;  %v985_v20 = vmul.f32 1.442695, %v882_v48 }
  0xec   : > { %v886_v26 = vmul.f32 0.5, %v4166_v17  ;;  %v3464_v16 = vpop.eup %1715  ;;  %v4168_v46 = vsub.f32 %v3097_v60, %v3293_v33  ;;  %v4169_v38 = vsub.f32 %v3069_v50, %v3323_v21  ;;  %1741 = vpow2.f32 %v979_v53 }
  0xed   : > { %v887_v9 = vmul.f32 0.5, %v4167_v28  ;;  %v987_v12 = vmul.f32 1.442695, %v883_v51  ;;  %v3472_v22 = vpop.eup %1717  ;;  %v4170_v1 = vsub.f32 %v3099_v30, %v3303_v42  ;;  %v4171_v48 = vsub.f32 %v3071_v8, %v3333_v15 }
  0xee   : > { %v888_v55 = vmul.f32 0.5, %v4168_v46  ;;  %v891_v56 = vmul.f32 0.5, %v4169_v38  ;;  %1743 = vpow2.f32 %v981_v41  ;;  %v989_v28 = vmul.f32 1.442695, %v884_v27  ;;  %v3480_v33 = vpop.eup %1719 }
  0xef   : > { %v889_v17 = vmul.f32 0.5, %v4170_v1  ;;  %v892_v25 = vmul.f32 0.5, %v4171_v48  ;;  %v4172_v21 = vsub.f32 %v3103_v18, %v3313_v63  ;;  %v4173_v51 = vsub.f32 %v3073_v61, %v3343_v5  ;;  %v3488_v42 = vpop.eup %1721 }
  0xf0   : > { %1745 = vpow2.f32 %v983_v54  ;;  %v991_v38 = vmul.f32 1.442695, %v885_v58  ;;  %v4174_v15 = vsub.f32 %v3075_v59, %v3353_v7  ;;  %v4175_v27 = vsub.f32 %v3077_v10, %v3363_v13  ;;  %v3496_v63 = vpop.eup %1723 }
  0xf1   : > { %v890_v46 = vmul.f32 0.5, %v4172_v21  ;;  %v893_v53 = vmul.f32 0.5, %v4173_v51  ;;  %1747 = vpow2.f32 %v985_v20  ;;  %v993_v48 = vmul.f32 1.442695, %v886_v26  ;;  %v3504_v51 = vpop.eup %1725 }
  0xf2   : > { %v894_v1 = vmul.f32 0.5, %v4174_v15  ;;  %v895_v41 = vmul.f32 0.5, %v4175_v27  ;;  %v4176_v5 = vsub.f32 %v3079_v52, %v3373_v57  ;;  %v4177_v58 = vsub.f32 %v3081_v32, %v3383_v29  ;;  %v3512_v57 = vpop.eup %1727 }
  0xf3   : > { %1749 = vpow2.f32 %v987_v12  ;;  %v1003_v7 = vmul.f32 1.442695, %v891_v56  ;;  %v4178_v13 = vsub.f32 %v3083_v36, %v3393_v3  ;;  %v4179_v26 = vsub.f32 %v3085_v31, %v2914_v19  ;;  %v3521_v3 = vpop.eup %1729 }
  0xf4   : > { %v896_v54 = vmul.f32 0.5, %v4176_v5  ;;  %v897_v21 = vmul.f32 0.5, %v4177_v58  ;;  %1751 = vpow2.f32 %v989_v28  ;;  %v1005_v27 = vmul.f32 1.442695, %v892_v25 }
  0xf5   : > { %v898_v20 = vmul.f32 0.5, %v4178_v13  ;;  %v899_v15 = vmul.f32 0.5, %v4179_v26  ;;  %v4180_v29 = vsub.f32 %v3087_v45, %v2917_v62  ;;  %v4181_v56 = vsub.f32 %v3089_v6, %v2920_v14  ;;  %v3526_v26 = vpop.eup %1731 }
  0xf6   : > { %1753 = vpow2.f32 %v991_v38  ;;  %v1007_v58 = vmul.f32 1.442695, %v893_v53  ;;  %v4182_v19 = vsub.f32 %v3091_v0, %v2930_v37  ;;  %v903_v25 = vmul.f32 0.5, %v839_v47  ;;  %v1734_v14 = vpop.eup %1733 }
  0xf7   : > { %v900_v5 = vmul.f32 0.5, %v4180_v29  ;;  %v901_v12 = vmul.f32 0.5, %v4181_v56  ;;  %1755 = vpow2.f32 %v993_v48  ;;  %v1009_v13 = vmul.f32 1.442695, %v894_v1  ;;  %v1736_v30 = vpop.eup %1735 }
  0xf8   : > { %v902_v28 = vmul.f32 0.5, %v4182_v19  ;;  %v904_v62 = vmul.f32 0.5, %v840_v23  ;;  %v905_v29 = vmul.f32 0.5, %v841_v44  ;;  %1757 = vpow2.f32 %v1003_v7  ;;  %v1738_v47 = vpop.eup %1737 }
  0xf9   : > { %v1011_v18 = vmul.f32 1.442695, %v895_v41  ;;  %v906_v56 = vmul.f32 0.5, %v842_v49  ;;  %1759 = vpow2.f32 %v1005_v27  ;;  %v1013_v53 = vmul.f32 1.442695, %v896_v54  ;;  %v1740_v23 = vpop.eup %1739 }
  0xfa   : > { %v3528_v38 = vstv %s1589_s21  ;;  %v995_v60 = vmul.f32 1.442695, %v887_v9  ;;  %v997_v40 = vmul.f32 1.442695, %v888_v55  ;;  %1761 = vpow2.f32 %v1007_v58  ;;  %v1742_v54 = vpop.eup %1741 }
  0xfb   : > { %v1015_v37 = vmul.f32 1.442695, %v897_v21  ;;  %v999_v48 = vmul.f32 1.442695, %v889_v17  ;;  %v1001_v1 = vmul.f32 1.442695, %v890_v46  ;;  %1763 = vpow2.f32 %v1009_v13  ;;  %v1744_v55 = vpop.eup %1743 }
  0xfc   : > { %v1017_v19 = vmul.f32 1.442695, %v898_v20  ;;  %1765 = vpow2.f32 %v1011_v18  ;;  %v1019_v44 = vmul.f32 1.442695, %v899_v15  ;;  %v1021_v41 = vmul.f32 1.442695, %v900_v5 }
  0xfd   : > { %v4183_v7 = vlaneseq  ;;  %1767 = vpow2.f32 %v1013_v53  ;;  %v1023_v27 = vmul.f32 1.442695, %v901_v12  ;;  %v1025_v0 = vmul.f32 1.442695, %v902_v28  ;;  %v1746_v46 = vpop.eup %1745  ;;  %v4184_v20 = vld [vmem:[#allocation60_spill] sm:$0xff]  ;;  %v4185_v13 = vld [vmem:[#allocation61_spill] sm:$0xff] }
  0xfe   : > { %v1027_v9 = vmul.f32 1.442695, %v903_v25  ;;  %1769 = vpow2.f32 %v1015_v37  ;;  %v1029_v21 = vmul.f32 1.442695, %v904_v62  ;;  %v1031_v58 = vmul.f32 1.442695, %v905_v29  ;;  %v1748_v5 = vpop.eup %1747 }
  0xff   : > { %v3531_v49 = vand.u32 127, %v4183_v7  ;;  %v1035_v17 = vadd.f32 %v3414_v11, %v3260_v34  ;;  %1771 = vpow2.f32 %v1017_v19  ;;  %v1033_v18 = vmul.f32 1.442695, %v906_v56  ;;  %v4186_v34 = vld [vmem:[#allocation62_spill] sm:$0xff]  ;;  %v4187_v56 = vld [vmem:[#allocation63_spill] sm:$0xff]  ;;  %v4188_v19 = vld [vmem:[#allocation64_spill] sm:$0xff] }
 0x100   : > { %v1044_v15 = vadd.f32 %v3421_v4, %v4184_v20  ;;  %1773 = vpow2.f32 %v995_v60  ;;  %v1053_v12 = vadd.f32 %v3428_v39, %v4185_v13  ;;  %v3545_v62 = vpop.eup %1749  ;;  %v1062_v11 = vadd.f32 %v3435_v24, %v4186_v34 }
 0x101   : > { %v3540_v28 = vadd.s32 128, %v3531_v49  ;;  %v3543_v25 = vadd.s32 256, %v3531_v49  ;;  %1775 = vpow2.f32 %v997_v40  ;;  %v3550_v29 = vadd.s32 384, %v3531_v49  ;;  %v3555_v4 = vpop.eup %1751 }
 0x102   : > { %v3553_v60 = vadd.s32 512, %v3531_v49  ;;  %1777 = vpow2.f32 %v999_v48  ;;  %v1036_v39 = vadd.f32 %v1734_v14, %v1035_v17  ;;  %v1071_v53 = vadd.f32 %v3442_v43, %v4187_v56  ;;  %v4189_v48 = vld [vmem:[#allocation68_spill] sm:$0xff]  ;;  %v4190_v17 = vld [vmem:[#allocation53_spill] sm:$0xff] }
 0x103   : > { %v3560_v37 = vadd.s32 640, %v3531_v49  ;;  %v3562_v40 = vpop.eup %1753  ;;  %1779 = vpow2.f32 %v1001_v1  ;;  %v1045_v24 = vadd.f32 %v1736_v30, %v1044_v15  ;;  %v1080_v7 = vadd.f32 %v3449_v35, %v4188_v19  ;;  %v4191_v30 = vld [vmem:[#allocation54_spill] sm:$0xff]  ;;  %v4192_v35 = vld [vmem:[#allocation55_spill] sm:$0xff] }
 0x104   : > { %v3567_v20 = vadd.s32 768, %v3531_v49  ;;  %v3569_v13 = vpop.eup %1755  ;;  %1781 = vpow2.f32 %v1019_v44  ;;  %v1054_v14 = vadd.f32 %v1738_v47, %v1053_v12  ;;  %v1089_v43 = vadd.f32 %v3456_v2, %v4189_v48  ;;  %v4193_v47 = vld [vmem:[#allocation56_spill] sm:$0xff] }
 0x105   : > { %v1098_v34 = vadd.f32 %v3464_v16, %v4190_v17  ;;  %v1758_v56 = vpop.eup %1757  ;;  %1783 = vpow2.f32 %v1021_v41  ;;  %v1063_v1 = vadd.f32 %v1740_v23, %v1062_v11  ;;  %v1107_v15 = vadd.f32 %v3472_v22, %v4191_v30  ;;  %v4194_v17 = vld [vmem:[#allocation65_spill] sm:$0xff] }
 0x106   : > { %v1116_v19 = vadd.f32 %v3480_v33, %v4192_v35  ;;  %v1760_v6 = vpop.eup %1759  ;;  %1785 = vpow2.f32 %v1023_v27  ;;  %v1037_v45 = vadd.f32 %v1758_v56, %v1036_v39  ;;  %v1072_v44 = vadd.f32 %v1742_v54, %v1071_v53 }
 0x107   : > { %v1125_v12 = vadd.f32 %v3488_v42, %v4193_v47  ;;  %v1762_v2 = vpop.eup %1761  ;;  %1787 = vpow2.f32 %v1025_v0  ;;  %v1046_v48 = vadd.f32 %v1760_v6, %v1045_v24  ;;  %v1081_v16 = vadd.f32 %v1744_v55, %v1080_v7 }
 0x108   : > { %v1134_v23 = vadd.f32 %v3496_v63, %v4194_v17  ;;  %v1764_v41 = vpop.eup %1763  ;;  %1789 = vpow2.f32 %v1027_v9  ;;  %v1038_v22 = vrot.slane %v1037_v45, 4  ;;  %v1055_v11 = vadd.f32 %v1762_v2, %v1054_v14 }
 0x109   : > { %v1090_v30 = vadd.f32 %v1746_v46, %v1089_v43  ;;  %v1766_v33 = vpop.eup %1765  ;;  %1791 = vpow2.f32 %v1029_v21  ;;  %v1047_v27 = vrot.slane %v1046_v48, 4  ;;  %v1064_v39 = vadd.f32 %v1764_v41, %v1063_v1  ;;  %v4195_v41 = vld [vmem:[#allocation66_spill] sm:$0xff] }
 0x10a   : > { %v1099_v54 = vadd.f32 %v1748_v5, %v1098_v34  ;;  %v1768_v53 = vpop.eup %1767  ;;  %1793 = vpow2.f32 %v1031_v58  ;;  %v1039_v42 = vadd.f32 %v1038_v22, %v1037_v45  ;;  %v1056_v56 = vrot.slane %v1055_v11, 4  ;;  %v4196_v22 = vld [vmem:[#allocation67_spill] sm:$0xff] }
 0x10b   : > { %v1073_v0 = vadd.f32 %v1766_v33, %v1072_v44  ;;  %v1770_v6 = vpop.eup %1769  ;;  %1795 = vpow2.f32 %v1033_v18  ;;  %v1048_v55 = vadd.f32 %v1047_v27, %v1046_v48  ;;  %v1065_v24 = vrot.slane %v1064_v39, 4 }
 0x10c   : > { %v1082_v63 = vadd.f32 %v1768_v53, %v1081_v16  ;;  %v1772_v7 = vpop.eup %1771  ;;  %v1040_v9 = vrot.slane %v1039_v42, 2  ;;  %v1057_v35 = vadd.f32 %v1056_v56, %v1055_v11  ;;  %v1091_v46 = vadd.f32 %v1770_v6, %v1090_v30  ;;  %v4198_v53 = vld [vmem:[#allocation13_spill] sm:$0xff] }
 0x10d   : > { %v1074_v14 = vrot.slane %v1073_v0, 4  ;;  %v1774_v43 = vpop.eup %1773  ;;  %v1049_v21 = vrot.slane %v1048_v55, 2  ;;  %v1066_v47 = vadd.f32 %v1065_v24, %v1064_v39  ;;  %v1100_v5 = vadd.f32 %v1772_v7, %v1099_v54  ;;  %v4197_v39 = vld [vmem:[#allocation12_spill] sm:$0xff] }
 0x10e   : > { %v1083_v1 = vrot.slane %v1082_v63, 4  ;;  %v1776_v34 = vpop.eup %1775  ;;  %v1041_v58 = vadd.f32 %v1040_v9, %v1039_v42  ;;  %v1058_v45 = vrot.slane %v1057_v35, 2  ;;  %v1092_v44 = vrot.slane %v1091_v46, 4 }
 0x10f   : > { %v1075_v2 = vadd.f32 %v1074_v14, %v1073_v0  ;;  %v1778_v17 = vpop.eup %1777  ;;  %v1050_v18 = vadd.f32 %v1049_v21, %v1048_v55  ;;  %v1067_v48 = vrot.slane %v1066_v47, 2  ;;  %v1143_v16 = vadd.f32 %v3504_v51, %v4195_v41 }
 0x110   : > { %v1152_v11 = vadd.f32 %v3512_v57, %v4196_v22  ;;  %v1780_v30 = vpop.eup %1779  ;;  %v1084_v33 = vadd.f32 %v1083_v1, %v1082_v63  ;;  %v1108_v27 = vadd.f32 %v3545_v62, %v1107_v15  ;;  %v1161_v54 = vadd.f32 %v3521_v3, %v4197_v39 }
 0x111   : > { %v1170_v42 = vadd.f32 %v3526_v26, %v4198_v53  ;;  %v1782_v56 = vpop.eup %1781  ;;  %v1042_v0 = vrot.slane %v1041_v58, 1  ;;  %v3592_v6 = vadd.f32 %v1058_v45, %v1057_v35  ;;  %v1101_v55 = vrot.slane %v1100_v5, 4 }
 0x112   : > { %v1117_v51 = vadd.f32 %v3555_v4, %v1116_v19  ;;  %v1784_v24 = vpop.eup %1783  ;;  %v1076_v7 = vrot.slane %v1075_v2, 2  ;;  %v1093_v57 = vadd.f32 %v1092_v44, %v1091_v46  ;;  %v1126_v63 = vadd.f32 %v3562_v40, %v1125_v12 }
 0x113   : > { %v1135_v62 = vadd.f32 %v3569_v13, %v1134_v23  ;;  %v1786_v15 = vpop.eup %1785  ;;  %v1051_v9 = vrot.slane %v1050_v18, 1  ;;  %v1068_v3 = vadd.f32 %v1067_v48, %v1066_v47  ;;  %v1144_v14 = vadd.f32 %v1774_v43, %v1143_v16 }
 0x114   : > { %v1153_v21 = vadd.f32 %v1776_v34, %v1152_v11  ;;  %v1788_v26 = vpop.eup %1787  ;;  %v1085_v1 = vrot.slane %v1084_v33, 2  ;;  %v1109_v41 = vadd.f32 %v1782_v56, %v1108_v27  ;;  %v1162_v35 = vadd.f32 %v1778_v17, %v1161_v54 }
 0x115   : > { %v1171_v45 = vadd.f32 %v1780_v30, %v1170_v42  ;;  %v1790_v22 = vpop.eup %1789  ;;  %v1043_v39 = vadd.f32 %v1042_v0, %v1041_v58  ;;  %v1060_v4 = vrot.slane %v3592_v6, 1  ;;  %v1102_v19 = vadd.f32 %v1101_v55, %v1100_v5 }
 0x116   : > { %v1118_v46 = vadd.f32 %v1784_v24, %v1117_v51  ;;  %v1792_v44 = vpop.eup %1791  ;;  %v1077_v40 = vadd.f32 %v1076_v7, %v1075_v2  ;;  %v1094_v12 = vrot.slane %v1093_v57, 2  ;;  %v1110_v13 = vrot.slane %v1109_v41, 4 }
 0x117   : > { %v1127_v23 = vadd.f32 %v1786_v15, %v1126_v63  ;;  %v1794_v53 = vpop.eup %1793  ;;  %v1052_v47 = vadd.f32 %v1051_v9, %v1050_v18  ;;  %v1069_v43 = vrot.slane %v1068_v3, 1  ;;  %v1136_v48 = vadd.f32 %v1788_v26, %v1135_v62 }
 0x118   : > { %v1119_v34 = vrot.slane %v1118_v46, 4  ;;  %v1796_v16 = vpop.eup %1795  ;;  %v1086_v11 = vadd.f32 %v1085_v1, %v1084_v33  ;;  %v1111_v17 = vadd.f32 %v1110_v13, %v1109_v41  ;;  %v1145_v27 = vadd.f32 %v1790_v22, %v1144_v14 }
 0x119   : > { %v1128_v30 = vrot.slane %v1127_v23, 4  ;;  %v1103_v58 = vrot.slane %v1102_v19, 2  ;;  %v1137_v42 = vrot.slane %v1136_v48, 4  ;;  %v1154_v5 = vadd.f32 %v1792_v44, %v1153_v21 }
 0x11a   : > { %v1120_v54 = vadd.f32 %v1119_v34, %v1118_v46  ;;  %v1112_v56 = vrot.slane %v1111_v17, 2  ;;  %v1146_v2 = vrot.slane %v1145_v27, 4  ;;  %v1163_v55 = vadd.f32 %v1794_v53, %v1162_v35 }
 0x11b   : > { %v1129_v0 = vadd.f32 %v1128_v30, %v1127_v23  ;;  %v1138_v24 = vadd.f32 %v1137_v42, %v1136_v48  ;;  %v1155_v7 = vrot.slane %v1154_v5, 4  ;;  %v1172_v18 = vadd.f32 %v1796_v16, %v1171_v45 }
 0x11c   : > { %v1121_v51 = vrot.slane %v1120_v54, 2  ;;  %v1095_v63 = vadd.f32 %v1094_v12, %v1093_v57  ;;  %v1147_v62 = vadd.f32 %v1146_v2, %v1145_v27  ;;  %v1164_v9 = vrot.slane %v1163_v55, 4 }
 0x11d   : > { %v1130_v15 = vrot.slane %v1129_v0, 2  ;;  %v1104_v33 = vadd.f32 %v1103_v58, %v1102_v19  ;;  %v1139_v26 = vrot.slane %v1138_v24, 2  ;;  %v1156_v1 = vadd.f32 %v1155_v7, %v1154_v5 }
 0x11e   : > { %v1173_v14 = vrot.slane %v1172_v18, 4  ;;  %v1078_v41 = vrot.slane %v1077_v40, 1  ;;  %v1113_v22 = vadd.f32 %v1112_v56, %v1111_v17  ;;  %v1148_v46 = vrot.slane %v1147_v62, 2 }
 0x11f   : > { %v1165_v21 = vadd.f32 %v1164_v9, %v1163_v55  ;;  %v1087_v44 = vrot.slane %v1086_v11, 1  ;;  %v1122_v13 = vadd.f32 %v1121_v51, %v1120_v54  ;;  %v1157_v23 = vrot.slane %v1156_v1, 2 }
 0x120   : > { %v1174_v35 = vadd.f32 %v1173_v14, %v1172_v18  ;;  %v1061_v53 = vadd.f32 %v1060_v4, %v3592_v6  ;;  %v1096_v34 = vrot.slane %v1095_v63, 1  ;;  %v1131_v45 = vadd.f32 %v1130_v15, %v1129_v0 }
 0x121   : > { %v1166_v57 = vrot.slane %v1165_v21, 2  ;;  %v1070_v12 = vadd.f32 %v1069_v43, %v1068_v3  ;;  %v1105_v48 = vrot.slane %v1104_v33, 1  ;;  %v1140_v16 = vadd.f32 %v1139_v26, %v1138_v24 }
 0x122   : > { %v1175_v19 = vrot.slane %v1174_v35, 2  ;;  %v1079_v30 = vadd.f32 %v1078_v41, %v1077_v40  ;;  %v1114_v27 = vrot.slane %v1113_v22, 1  ;;  %v1149_v58 = vadd.f32 %v1148_v46, %v1147_v62 }
 0x123   : > { %1797 = vlog2.f32 %v1043_v39  ;;  %v1088_v17 = vadd.f32 %v1087_v44, %v1086_v11  ;;  %v1123_v42 = vrot.slane %v1122_v13, 1  ;;  %v1158_v5 = vadd.f32 %v1157_v23, %v1156_v1 }
 0x124   : > { %1799 = vlog2.f32 %v1052_v47  ;;  %v1097_v54 = vadd.f32 %v1096_v34, %v1095_v63  ;;  %v1132_v56 = vrot.slane %v1131_v45, 1  ;;  %v1167_v2 = vadd.f32 %v1166_v57, %v1165_v21 }
 0x125   : > { %1801 = vlog2.f32 %v1061_v53  ;;  %v1106_v6 = vadd.f32 %v1105_v48, %v1104_v33  ;;  %v1141_v4 = vrot.slane %v1140_v16, 1  ;;  %v1176_v0 = vadd.f32 %v1175_v19, %v1174_v35 }
 0x126   : > { %1803 = vlog2.f32 %v1070_v12  ;;  %v1115_v3 = vadd.f32 %v1114_v27, %v1113_v22  ;;  %v1150_v43 = vrot.slane %v1149_v58, 1  ;;  %v1270_v40 = vadd.s32 896, %v3531_v49 }
 0x127   : > { %1805 = vlog2.f32 %v1079_v30  ;;  %v1124_v55 = vadd.f32 %v1123_v42, %v1122_v13  ;;  %v1159_v51 = vrot.slane %v1158_v5, 1  ;;  %v1271_v39 = vadd.s32 1024, %v3531_v49 }
 0x128   : > { %1807 = vlog2.f32 %v1088_v17  ;;  %v1133_v11 = vadd.f32 %v1132_v56, %v1131_v45  ;;  %v1168_v47 = vrot.slane %v1167_v2, 1  ;;  %v1272_v24 = vadd.s32 1152, %v3531_v49 }
 0x129   : > { %1809 = vlog2.f32 %v1097_v54  ;;  %v1142_v7 = vadd.f32 %v1141_v4, %v1140_v16  ;;  %v1177_v18 = vrot.slane %v1176_v0, 1  ;;  %v1273_v63 = vadd.s32 1280, %v3531_v49 }
 0x12a   : > { %1811 = vlog2.f32 %v1106_v6  ;;  %v1151_v15 = vadd.f32 %v1150_v43, %v1149_v58  ;;  %v1274_v62 = vadd.s32 1408, %v3531_v49  ;;  %v1275_v9 = vadd.s32 1536, %v3531_v49 }
 0x12b   : > { %1813 = vlog2.f32 %v1115_v3  ;;  %v1160_v33 = vadd.f32 %v1159_v51, %v1158_v5  ;;  %v1276_v26 = vadd.s32 1664, %v3531_v49  ;;  %v1277_v1 = vadd.s32 1792, %v3531_v49 }
 0x12c   : > { %1815 = vlog2.f32 %v1124_v55  ;;  %v1169_v14 = vadd.f32 %v1168_v47, %v1167_v2  ;;  %v1278_v41 = vadd.s32 1920, %v3531_v49  ;;  %v3610_v22 = vadd.s32 %v3528_v38, %v3531_v49 }
 0x12d   : > { %1817 = vlog2.f32 %v1133_v11  ;;  %v1178_v46 = vadd.f32 %v1177_v18, %v1176_v0  ;;  %v3614_v21 = vadd.s32 %v3528_v38, %v3540_v28  ;;  %v2008_v44 = vmov 1966171168  }
 0x12e   : > { %1819 = vlog2.f32 %v1142_v7  ;;  %v1351_v13 = vunpack.c.l.s4 %v2008_v44  ;;  %v3618_v23 = vadd.s32 %v3528_v38, %v3543_v25  ;;  %v3622_v35 = vadd.s32 %v3528_v38, %v3550_v29 }
 0x12f   : > { %1821 = vlog2.f32 %v1151_v15  ;;  %v3626_v49 = vadd.s32 %v3528_v38, %v3553_v60  ;;  %v3630_v28 = vadd.s32 %v3528_v38, %v3560_v37  ;;  %v3634_v34 = vadd.s32 %v3528_v38, %v3567_v20 }
 0x130   : > { %v1798_v53 = vpop.eup %1797  ;;  %1823 = vlog2.f32 %v1160_v33  ;;  %v3637_v25 = vadd.s32 %v3528_v38, %v1270_v40  ;;  %v3640_v57 = vadd.s32 %v3528_v38, %v1271_v39  ;;  %v3643_v60 = vadd.s32 %v3528_v38, %v1272_v24  ;;  %v4199_v39 = vld [vmem:[#allocation18_spill] sm:$0xff] }
 0x131   : > { %v1800_v45 = vpop.eup %1799  ;;  %v1180_v29 = vmul.f32 0.6931472, %v1798_v53  ;;  %1825 = vlog2.f32 %v1169_v14  ;;  %v3646_v37 = vadd.s32 %v3528_v38, %v1273_v63  ;;  %v1352_v20 = vunpack.c.0.s8 %v1351_v13  ;;  %v4200_v63 = vld [vmem:[#allocation45_spill] sm:$0xff] }
 0x132   : > { %v1802_v12 = vpop.eup %1801  ;;  %v1182_v48 = vmul.f32 0.6931472, %v1800_v45  ;;  %1827 = vlog2.f32 %v1178_v46  ;;  %v3649_v27 = vadd.s32 %v3528_v38, %v1274_v62  ;;  %v3652_v58 = vadd.s32 %v3528_v38, %v1275_v9  ;;  %v4201_v9 = vld [vmem:[#allocation52_spill] sm:$0xff] }
 0x133   : > { %v1804_v16 = vpop.eup %1803  ;;  %v1184_v19 = vmul.f32 0.6931472, %v1802_v12  ;;  %v1212_v30 = vmul.f32 2.0, %v1180_v29  ;;  %v3655_v54 = vadd.s32 %v3528_v38, %v1276_v26  ;;  %v3658_v56 = vadd.s32 %v3528_v38, %v1277_v1  ;;  %v4203_v45 = vld [vmem:[#allocation40_spill] sm:$0xff] }
 0x134   : > { %v1806_v17 = vpop.eup %1805  ;;  %v1186_v42 = vmul.f32 0.6931472, %v1804_v16  ;;  %v1213_v5 = vmul.f32 2.0, %v1182_v48  ;;  %v3662_v3 = vadd.s32 %v3528_v38, %v1278_v41  ;;  %vm1296_vm7 = vcmp.lt.s32.totalorder %v3610_v22, 4000  ;;  %v4202_v41 = vld [vmem:[#allocation39_spill] sm:$0xff]  ;;  %v4204_v16 = vld [vmem:[#allocation41_spill] sm:$0xff] }
 0x135   : > { %v1808_v2 = vpop.eup %1807  ;;  %v1188_v6 = vmul.f32 0.6931472, %v1806_v17  ;;  %v1214_v4 = vmul.f32 2.0, %v1184_v19  ;;  %v1228_v0 = vsub.f32 %v3069_v50, %v1212_v30  ;;  %v3667_v11 = vsub.s32 %v1352_v20, %v4199_v39  ;;  %v4207_v39 = vld [vmem:[#allocation19_spill] sm:$0xff] }
 0x136   : > { %v1810_v43 = vpop.eup %1809  ;;  %v1190_v40 = vmul.f32 0.6931472, %v1808_v2  ;;  %v1215_v55 = vmul.f32 2.0, %v1186_v42  ;;  %v1229_v51 = vsub.f32 %v3071_v8, %v1213_v5  ;;  %vm1297_vm4 = vcmp.lt.s32.totalorder %v3614_v21, 4000  ;;  %v4205_v5 = vld [vmem:[#allocation49_spill] sm:$0xff]  ;;  %v4219_v22 = vld [vmem:[#allocation59_spill] sm:$0xff] }
 0x137   : > { %v1812_v47 = vpop.eup %1811  ;;  %v1192_v24 = vmul.f32 0.6931472, %v1810_v43  ;;  %v1216_v7 = vmul.f32 2.0, %v1188_v6  ;;  %v1230_v18 = vsub.f32 %v3073_v61, %v1214_v4  ;;  %v3671_v50 = vsub.f32 %v4200_v63, %v1228_v0  ;;  %v4206_v43 = vld [vmem:[#allocation50_spill] sm:$0xff] }
 0x138   : > { %v1814_v38 = vpop.eup %1813  ;;  %v1194_v15 = vmul.f32 0.6931472, %v1812_v47  ;;  %v1217_v62 = vmul.f32 2.0, %v1190_v40  ;;  %v1231_v8 = vsub.f32 %v3075_v59, %v1215_v55  ;;  %v1245_v33 = vsub.f32 %v4201_v9, %v1229_v51 }
 0x139   : > { %vm1298_vm6 = vcmp.lt.s32.totalorder %v3618_v23, 4000  ;;  %vm1299_vm12 = vcmp.lt.s32.totalorder %v3622_v35, 4000  ;;  %v1816_v26 = vpop.eup %1815  ;;  %v1196_v1 = vmul.f32 0.6931472, %v1814_v38  ;;  %v1218_v14 = vmul.f32 2.0, %v1192_v24  ;;  %v4208_v24 = vld [vmem:[#allocation51_spill] sm:$0xff] }
 0x13a   : > { %v1232_v61 = vsub.f32 %v3077_v10, %v1216_v7  ;;  %v1246_v46 = vsub.f32 %v4202_v41, %v1230_v18  ;;  %vm1300_vm13 = vcmp.lt.s32.totalorder %v3626_v49, 4000  ;;  %vm1301_vm14 = vcmp.lt.s32.totalorder %v3630_v28, 4000  ;;  %v1818_v44 = vpop.eup %1817 }
 0x13b   : > { %v1198_v13 = vmul.f32 0.6931472, %v1816_v26  ;;  %v1219_v59 = vmul.f32 2.0, %v1194_v15  ;;  %v1233_v53 = vsub.f32 %v3079_v52, %v1217_v62  ;;  %v1247_v29 = vsub.f32 %v4203_v45, %v1231_v8  ;;  %v1820_v10 = vpop.eup %1819  ;;  %v4209_v15 = vld [vmem:[#allocation20_spill] sm:$0xff]  ;;  %v4210_v8 = vld [vmem:[#allocation69_spill] sm:$0xff] }
 0x13c   : > { %vm1302_vm10 = vcmp.lt.s32.totalorder %v3634_v34, 4000  ;;  %vm1303_vm9 = vcmp.lt.s32.totalorder %v3637_v25, 4000  ;;  %vm1304_vm11 = vcmp.lt.s32.totalorder %v3640_v57, 4000  ;;  %v1200_v12 = vmul.f32 0.6931472, %v1818_v44  ;;  %v1822_v52 = vpop.eup %1821 }
 0x13d   : > { %v1220_v48 = vmul.f32 2.0, %v1196_v1  ;;  %v1234_v20 = vsub.f32 %v3081_v32, %v1218_v14  ;;  %v1248_v19 = vsub.f32 %v4204_v16, %v1232_v61  ;;  %vm1305_vm15 = vcmp.lt.s32.totalorder %v3643_v60, 4000  ;;  %v1824_v32 = vpop.eup %1823  ;;  %v4211_v1 = vld [vmem:[#allocation21_spill] sm:$0xff]  ;;  %v4212_v61 = vld [vmem:[#allocation23_spill] sm:$0xff] }
 0x13e   : > { %vm1306_vm0 = vcmp.lt.s32.totalorder %v3646_v37, 4000  ;;  %vm1307_vm1 = vcmp.lt.s32.totalorder %v3649_v27, 4000  ;;  %v1202_v30 = vmul.f32 0.6931472, %v1820_v10  ;;  %v1221_v17 = vmul.f32 2.0, %v1198_v13  ;;  %v1826_v55 = vpop.eup %1825  ;;  %v4213_v13 = vld [vmem:[#allocation32_spill] sm:$0xff] }
 0x13f   : > { %v1235_v42 = vsub.f32 %v3083_v36, %v1219_v59  ;;  %v1249_v2 = vsub.f32 %v4205_v5, %v1233_v53  ;;  %vm1308_vm2 = vcmp.lt.s32.totalorder %v3652_v58, 4000  ;;  %vm1309_vm5 = vcmp.lt.s32.totalorder %v3655_v54, 4000  ;;  %v1828_v18 = vpop.eup %1827  ;;  %v4214_v53 = vld [vmem:[#allocation70_spill] sm:$0xff]  ;;  %v4216_v16 = vld [vmem:[#allocation25_spill] sm:$0xff]  ;;  %v4218_v5 = vld [vmem:[#allocation71_spill] sm:$0xff] }
 0x140   : > { %vm1310_vm8 = vcmp.lt.s32.totalorder %v3658_v56, 4000  ;;  %v1204_v6 = vmul.f32 0.6931472, %v1822_v52  ;;  %v1222_v4 = vmul.f32 2.0, %v1200_v12  ;;  %v1236_v0 = vsub.f32 %v3085_v31, %v1220_v48  ;;  %v4215_v48 = vld [vmem:[#allocation57_spill] sm:$0xff] }
 0x141   : > { %v1250_v40 = vsub.f32 %v4206_v43, %v1234_v20  ;;  %vm1311_vm3 = vcmp.lt.s32.totalorder %v3662_v3, 4000  ;;  %v1206_v51 = vmul.f32 0.6931472, %v1824_v32  ;;  %v1223_v36 = vmul.f32 2.0, %v1202_v30 }
 0x142   : > { %v1237_v47 = vsub.f32 %v4207_v39, %v1221_v17  ;;  %v1251_v7 = vsub.f32 %v4208_v24, %v1235_v42  ;;  %v1208_v63 = vmul.f32 0.6931472, %v1826_v55  ;;  %v1224_v38 = vmul.f32 2.0, %v1204_v6  ;;  %v4217_v17 = vld [vmem:[#allocation58_spill] sm:$0xff] }
 0x143   : > { %v1238_v62 = vsub.f32 %v4209_v15, %v1222_v4  ;;  %v1252_v9 = vsub.f32 %v4210_v8, %v1236_v0  ;;  %v1210_v26 = vmul.f32 0.6931472, %v1828_v18  ;;  %v1225_v31 = vmul.f32 2.0, %v1206_v51  ;;  %v4220_v0 = vld [vmem:[#allocation73_spill] sm:$0xff] }
 0x144   : > { %v1239_v14 = vsub.f32 %v4211_v1, %v1223_v36  ;;  %v1253_v41 = vsub.f32 %v4212_v61, %v1237_v47  ;;  %v1226_v44 = vmul.f32 2.0, %v1208_v63  ;;  %v1240_v59 = vsub.f32 %v4213_v13, %v1224_v38 }
 0x145   : > { %v1254_v45 = vsub.f32 %v4214_v53, %v1238_v62  ;;  %v1312_v10 = vsel %vm1296_vm7, %v3671_v50, 0.0  ;;  %v1227_v12 = vmul.f32 2.0, %v1210_v26  ;;  %v1241_v20 = vsub.f32 %v4215_v48, %v1225_v31 }
 0x146   : > { %v1255_v52 = vsub.f32 %v4216_v16, %v1239_v14  ;;  %v1313_v30 = vsel %vm1297_vm4, %v1245_v33, 0.0  ;;  %v1242_v42 = vsub.f32 %v4217_v17, %v1226_v44  ;;  %v1256_v32 = vsub.f32 %v4218_v5, %v1240_v59  ;;  %v4221_v33 = vld [vmem:[#allocation72_spill] sm:$0xff] }
 0x147   : > { %v1314_v6 = vsel %vm1298_vm6, %v1246_v46, 0.0  ;;  %v1315_v4 = vsel %vm1299_vm12, %v1247_v29, 0.0  ;;  %v1243_v50 = vsub.f32 %v4219_v22, %v1227_v12  ;;  %v1257_v43 = vsub.f32 %v4220_v0, %v1241_v20  ;;  %v4222_v46 = vld [vmem:[#allocation74_spill] sm:$0xff] }
 0x148   : > { %v1316_v55 = vsel %vm1300_vm13, %v1248_v19, 0.0  ;;  %v1317_v21 = vsel %vm1301_vm14, %v1249_v2, 0.0  ;;  %v1258_v51 = vsub.f32 %v4221_v33, %v1242_v42  ;;  %v1318_v36 = vsel %vm1302_vm10, %v1250_v40, 0.0 }
 0x149   : > { %v1319_v23 = vsel %vm1303_vm9, %v1251_v7, 0.0  ;;  %v1320_v35 = vsel %vm1304_vm11, %v1252_v9, 0.0  ;;  %v1259_v29 = vsub.f32 %v4222_v46, %v1243_v50  ;;  %v1321_v49 = vsel %vm1305_vm15, %v1253_v41, 0.0 }
 0x14a   : > { %v1322_v28 = vsel %vm1306_vm0, %v1254_v45, 0.0  ;;  %v1323_v19 = vsel %vm1307_vm1, %v1255_v52, 0.0  ;;  %v1324_v34 = vsel %vm1308_vm2, %v1256_v32, 0.0  ;;  %v1325_v25 = vsel %vm1309_vm5, %v1257_v43, 0.0 }
 0x14b   : > { %v1326_v57 = vsel %vm1310_vm8, %v1258_v51, 0.0  ;;  %v1346_v2 = vcombine.low %v1312_v10, %v1313_v30  ;;  %v1327_v60 = vsel %vm1311_vm3, %v1259_v29, 0.0  ;;  %v1347_v40 = vcombine.low %v1314_v6, %v1315_v4 }
 0x14c   : > { %v1348_v39 = vcombine.low %v1316_v55, %v1317_v21  ;;  %v1349_v37 = vcombine.low %v1318_v36, %v1319_v23  ;;  %v1395_v27 = vcombine.low %v1320_v35, %v1321_v49  ;;  %v1396_v24 = vcombine.low %v1322_v28, %v1323_v19 }
 0x14d   : > { %v1356_v47 = vrot.slane %v1346_v2, %v3667_v11  ;;  %v1397_v7 = vcombine.low %v1324_v34, %v1325_v25  ;;  %v1363_v58 = vrot.slane %v1347_v40, %v3667_v11  ;;  %v1398_v18 = vcombine.low %v1326_v57, %v1327_v60 }
 0x14e   : > { %v1370_v54 = vrot.slane %v1348_v39, %v3667_v11  ;;  %v1377_v56 = vrot.slane %v1349_v37, %v3667_v11  ;;  %v1405_v3 = vrot.slane %v1395_v27, %v3667_v11  ;;  %v1412_v63 = vrot.slane %v1396_v24, %v3667_v11 }
 0x14f   : > { %v1419_v38 = vrot.slane %v1397_v7, %v3667_v11  ;;  %v1378_v15 = vcombine.low %v1356_v47, %v1363_v58  ;;  %v1426_v8 = vrot.slane %v1398_v18, %v3667_v11 }
 0x150   : > { %v1379_v62 = vcombine.low %v1370_v54, %v1377_v56  ;;  %v1427_v9 = vcombine.low %v1405_v3, %v1412_v63 }
 0x151   : > { %v1386_v26 = vrot.slane %v1378_v15, %v3667_v11  ;;  %v1428_v1 = vcombine.low %v1419_v38, %v1426_v8 }
 0x152   : > { %v1393_v31 = vrot.slane %v1379_v62, %v3667_v11  ;;  %v1435_v14 = vrot.slane %v1427_v9, %v3667_v11 }
 0x153   : > { %v1442_v41 = vrot.slane %v1428_v1, %v3667_v11 }
 0x154   : > { %v1394_v61 = vcombine.low %v1386_v26, %v1393_v31 }
 0x155   : > { %v1443_v44 = vcombine.low %v1435_v14, %v1442_v41 }
 0x156   : > { %1455 = vst [vmem:[%s217_s28] sm:$0xff] %v1394_v61 }
 0x157   : > { %1456 = vst [vmem:[%s217_s28 + $0x8] sm:$0xff] %v1443_v44 }
 0x158   : > { %1930 = shalt.err (!%p1927_p4)
}
 0x159   : > { %s1931_s6 = scalar_lea.hbm %s1470_s8, 256  ;;  %s1935_s19 = scalar_lea.hbm %s3805_s2, 512 }
 0x15a   : > { %p1932_p7 = scmp.ne.s32.totalorder %s1470_s8, %s1931_s6  ;;  %p1936_p2 = scmp.lt.s32.totalorder %s1470_s8, %s3805_s2 }
 0x15b   : > { %p1937_p8 = scmp.lt.s32.totalorder %s1935_s19, %s1931_s6 }
 0x15c   : > { %p1933_p10 = pnand %p1932_p7, %p2076_p9 }
 0x15d   : > { %p1938_p0 = por %p1937_p8, %p1936_p2 }
 0x15e   : > { %p1934_p13 = pneg %p1933_p10 }
 0x160   : > { %p1939_p12 = pnand %p1938_p0, %p1934_p13 }
 0x162   : > { %1942 = shalt.err (!%p1939_p12)
}
 0x163   : > { %1602 = dma.vmem_to_hbm [thread:$0]  (%p2076_p9), %s1473_s29, 256, %s1470_s8, %s1458_s15  }
 0x164 PF: > { %s1484_s5 = sand.u32 1, %s1981_s9   ;;  %p4223_p1 = scmp.ge.s32.totalorder %s2001_s14, 2 }
 0x165   : > { %s1485_s26 = scalar_lea.sflag [#allocation5], %s1484_s5 }
 0x166   : > { %p1612_p3 = pnand %p4223_p1, %p2083_p11 }
 0x168   : > { %p1613_p5 = pneg %p1612_p3 }
 0x16a   : > { %1976 = dma.done.wait (%p1613_p5), %s1485_s26, 256  }
 0x16b   : > { %1978 = vsyncadd (%p1613_p5), %s1485_s26, 4294967040  ;;  %s21_s14 = sadd.s32 1, %s2001_s14   ;;  %s4224_s9 = smov %s1985_s10 }
 0x16c   : > { %p18_p6 = scmp.ge.s32.totalorder %s21_s14, 4   ;;  %s4225_s10 = smov %s1989_s11 }
 0x16d   : > { %s4226_s11 = smov %s2081_s23  ;;  %s4227_s12 = smov %s1997_s13 }
 0x16e   : > { %s4228_s13 = smov %s4230_s17  ;;  %20 = sbr.rel (!%p18_p6) target bundleno = 10 (0xa), region = 94 }
 0x173   :  { %1490 = vsyncpa [#allocation4], 1 }
 0x174   :  { %1492 = vsyncpa [#allocation4 + $0x1], 1 }
 0x175   :  { %1493 = vsyncpa [#allocation7], 1 }
 0x176   :  { %1495 = vsyncpa [#allocation7 + $0x1], 1 }
 0x177   :  { %1496 = vsyncpa [#allocation5], 1 }
 0x178   :  { %1498 = vsyncpa [#allocation5 + $0x1], 1 }

</bundles_post_ra>
